<compile_context>
chip_gen: v7x
topology: tpu7x:2x2x1
jax: 0.10.0
libtpu: 0.0.40
codegen_flags: <defaults>
</compile_context>

<pallas_src>
import jax
import jax.numpy as jnp
from jax.experimental import pallas as pl
from jax.experimental.pallas import tpu as pltpu

# ----------------------------- "args" config --------------------------------
MULTIRES = 4          # args.multires        (xyz frequencies)
MULTIRES_VIEWS = 2    # args.multires_views  (view-dir frequencies)
INPUT_CH_CAM = 4      # args.input_ch_cam
NETDEPTH = 8          # args.netdepth
NETWIDTH = 32         # args.netwidth
SKIPS = (4,)
SKIP_IN_LAYER = SKIPS[0] + 1   # layer whose input is cat([pts_emb, h])
BB_CENTER = 0.5       # args.bb_center
BB_SCALE = 2.0        # args.bb_scale
TRAINSET_LENGTH = 8

INPUT_CH = 3 + 3 * 2 * MULTIRES              # 27
INPUT_CH_VIEWS = 3 + 3 * 2 * MULTIRES_VIEWS  # 15
W_HALF = NETWIDTH // 2                       # 16

N_POINTS = 256
SLAB_LANES = 128
ALIGN = 16            # block row alignment in the bf16 slab

# ------------------------- stacking-scratch row map --------------------------
# Phase 1 (pts MLP): [x(3) | sin(2^k x)(12) | cos(2^k x)(12) | pad(5) | h(32)]
SK_X, SK_SIN, SK_COS = 0, 3, 15
PTS_K_PAD = 32          # layer-0 contraction rows (27 used + 5 zero pad)
SK_H = 32               # h rows for the skip layer
SKIP_K_PAD = 64         # skip-layer contraction rows (59 used + 5 zero pad)
# Phase 2 (view head, scratch reused): [feature(32) | d(3) | sin d(6) | cos d(6) | pad(1)]
SV_F, SV_D, SV_SIN, SV_COS = 0, 32, 35, 41
VIEW_K_PAD = 48         # view-head contraction rows (47 used + 1 zero pad)
STACK_ROWS = 64


# --------------------------- shared math helpers -----------------------------
def _softplus_b10(x):
    # F.softplus(x, beta=10) with default threshold=20 on beta*x
    bx = 10.0 * x
    return jnp.where(bx > 20.0, x, jnp.log1p(jnp.exp(jnp.minimum(bx, 20.0))) / 10.0)


def _bf16_roundtrip(x):
    return jnp.asarray(x, jnp.float32).astype(jnp.bfloat16).astype(jnp.float32)


def posenc(x, num_freqs):
    """Standard NeRF positional encoding (reference path only)."""
    out = [x]
    for k in range(num_freqs):
        f = float(2 ** k)
        out.append(jnp.sin(x * f))
        out.append(jnp.cos(x * f))
    return jnp.concatenate(out, axis=-1)


def prepare_input(x, t_dirs, embedded_cam):
    """Reference embedding: bb affine -> posenc; cat dir posenc + camera embed."""
    x = (x - BB_CENTER) * BB_SCALE
    emb = posenc(x, MULTIRES)
    emb_dirs = posenc(t_dirs, MULTIRES_VIEWS)
    cam = jnp.broadcast_to(embedded_cam[None, :], (x.shape[0], INPUT_CH_CAM))
    return jnp.concatenate([emb, emb_dirs, cam], axis=-1)


# ------------------------------ parameter init -------------------------------
def make_params(key):
    """Deterministic nn.Linear-style init (uniform +-1/sqrt(fan_in)), canonical layout."""
    shapes = []
    shapes.append((INPUT_CH, NETWIDTH))                               # pts_linears[0]
    for i in range(NETDEPTH - 1):
        fan_in = NETWIDTH + INPUT_CH if i in SKIPS else NETWIDTH
        shapes.append((fan_in, NETWIDTH))                             # pts_linears[1..7]
    shapes.append((NETWIDTH, NETWIDTH))                               # feature_linear
    shapes.append((NETWIDTH, 1))                                      # alpha_linear
    shapes.append((NETWIDTH + INPUT_CH_VIEWS + INPUT_CH_CAM, W_HALF))  # views_linears[0]
    shapes.append((W_HALF, 3))                                        # rgb_linear

    params = []
    for s in shapes:
        key, kw, kb = jax.random.split(key, 3)
        bound = 1.0 / (s[0] ** 0.5)
        w = jax.random.uniform(kw, s, jnp.float32, -bound, bound)
        b = jax.random.uniform(kb, (1, s[1]), jnp.float32, -bound, bound)
        params.extend([w, b])
    return params


# --------------------------- host-side weight packing -------------------------
def _align(n, m=ALIGN):
    return (n + m - 1) // m * m


def pack_weights(params, embedded_cam):
    """Repack canonical (w, b) params into one bf16 slab [R, 128].

    Each layer is one row-group: W^T (shape [C_out, K], K along lanes 0:K, padded
    with zeros to the kernel's stacked-input row order) plus its bias in the last
    lane column.  Returns (slab_bf16, layout) with layout[name] = (row_off, c_out, k).
    """
    ws = [(params[2 * i], params[2 * i + 1]) for i in range(len(params) // 2)]
    pts = ws[:NETDEPTH]
    (wf, bfeat), (wa, ba), (wv, bv), (wr, br) = ws[NETDEPTH:NETDEPTH + 4]

    blocks = []  # (name, [c_out, SLAB_LANES] f32 block, k)

    def add(name, wk, b):
        # wk: [K, C_out] in the kernel's stacked-input row order; b: [1, C_out]
        wk = jnp.asarray(wk, jnp.float32)
        b = jnp.asarray(b, jnp.float32)
        k, c_out = wk.shape
        blk = jnp.zeros((c_out, SLAB_LANES), jnp.float32)
        blk = blk.at[:, 0:k].set(wk.T)
        blk = blk.at[:, SLAB_LANES - 1].set(b[0])
        blocks.append((name, blk, k))

    def reorder_pts(w27):
        # posenc interleaved rows [x, sin_k, cos_k]_k  ->  [x, sin_all, cos_all]
        w_sin = jnp.concatenate([w27[3 + 6 * k:6 + 6 * k] for k in range(MULTIRES)], 0)
        w_cos = jnp.concatenate([w27[6 + 6 * k:9 + 6 * k] for k in range(MULTIRES)], 0)
        return jnp.concatenate([w27[0:3], w_sin, w_cos], 0)          # [27, C_out]

    # layer 0: merged [x | sin | cos], K padded 27 -> 32
    w0, b0 = pts[0]
    wk0 = jnp.zeros((PTS_K_PAD, NETWIDTH), jnp.float32).at[0:INPUT_CH].set(reorder_pts(w0))
    add("l0", wk0, b0)

    for i in range(1, NETDEPTH):
        w, b = pts[i]
        if i == SKIP_IN_LAYER:                   # input = cat([pts_emb(27), h(32)])
            wk = jnp.zeros((SKIP_K_PAD, NETWIDTH), jnp.float32)
            wk = wk.at[0:INPUT_CH].set(reorder_pts(w[:INPUT_CH]))
            wk = wk.at[SK_H:SK_H + NETWIDTH].set(w[INPUT_CH:])
            add("skip", wk, b)
        else:
            add(f"l{i}", w, b)

    # fused feature|alpha head: result rows = [feature(32) | alpha(1)]
    add("fa", jnp.concatenate([wf, wa], axis=1), jnp.concatenate([bfeat, ba], axis=1))

    # view head, input = [feature(32), d(3), sin d(6), cos d(6)]; cam folded into bias
    V = NETWIDTH
    wv_sin = jnp.concatenate([wv[V + 3 + 6 * k:V + 6 + 6 * k]
                              for k in range(MULTIRES_VIEWS)], 0)
    wv_cos = jnp.concatenate([wv[V + 6 + 6 * k:V + 9 + 6 * k]
                              for k in range(MULTIRES_VIEWS)], 0)
    wv_cam = wv[V + INPUT_CH_VIEWS:]
    wkv = jnp.zeros((VIEW_K_PAD, W_HALF), jnp.float32)
    wkv = wkv.at[SV_F:SV_F + V].set(wv[0:V])
    wkv = wkv.at[SV_D:SV_D + 3].set(wv[V:V + 3])
    wkv = wkv.at[SV_SIN:SV_SIN + 6].set(wv_sin)
    wkv = wkv.at[SV_COS:SV_COS + 6].set(wv_cos)
    # TODO(synk): re-pack the slab when set_camera_idx changes the camera embedding
    # (its constant contribution is folded into the view-head bias here).
    add("view", wkv, bv + embedded_cam[None, :] @ wv_cam)

    add("rgb", wr, br)

    layout = {}
    row = 0
    for name, blk, k in blocks:
        layout[name] = (row, blk.shape[0], k)
        row += _align(blk.shape[0])
    slab = jnp.zeros((row, SLAB_LANES), jnp.float32)
    for name, blk, _ in blocks:
        off, r, _ = layout[name]
        slab = slab.at[off:off + r, :].set(blk)
    return slab.astype(jnp.bfloat16), layout


# ------------------------------ Pallas kernel --------------------------------
def _make_nerf_kernel(layout):
    """Fused NeRF forward in a points-on-lanes ([C, T]) layout."""

    def kernel(xin_ref, slab_ref, out_ref, stack_ref):
        def W(name):                              # bf16 [c_out, k]
            off, r, k = layout[name]
            return slab_ref[off:off + r, 0:k]

        def B(name):                              # f32 [c_out, 1] (broadcast over lanes)
            off, r, _ = layout[name]
            return slab_ref[off:off + r, SLAB_LANES - 1:SLAB_LANES].astype(jnp.float32)

        def mm(name, h):                          # [c_out, T] f32 = W @ h (bf16 operands)
            return jnp.dot(W(name), h.astype(jnp.bfloat16),
                           preferred_element_type=jnp.float32)

        T = xin_ref.shape[1]
        xin = xin_ref[...]                        # [6, T] f32 (lane-dense input block)
        xT = (xin[0:3, :] - BB_CENTER) * BB_SCALE  # [3, T]
        dT = xin[3:6, :]                          # [3, T]

        # zero the K-pad rows that layer-0 / skip read but nothing writes this step
        stack_ref[INPUT_CH:PTS_K_PAD, :] = jnp.zeros((PTS_K_PAD - INPUT_CH, T),
                                                     jnp.float32)

        # ---- stacked pts input: posenc built with VPU multiplies + EUP sin/cos ----
        stack_ref[SK_X:SK_X + 3, :] = xT
        for k in range(MULTIRES):
            xk = xT * float(2 ** k)               # broadcast multiply, no MXU
            stack_ref[SK_SIN + 3 * k:SK_SIN + 3 * (k + 1), :] = jnp.sin(xk)
            stack_ref[SK_COS + 3 * k:SK_COS + 3 * (k + 1), :] = jnp.cos(xk)

        # ---- pts MLP: 8 layers, skip realized by sublane stacking (single matmuls) ----
        h = jax.nn.relu(mm("l0", stack_ref[0:PTS_K_PAD, :]) + B("l0"))
        for i in range(1, NETDEPTH):
            if i == SKIP_IN_LAYER:
                stack_ref[SK_H:SK_H + NETWIDTH, :] = h
                h = jax.nn.relu(mm("skip", stack_ref[0:SKIP_K_PAD, :]) + B("skip"))
            else:
                h = jax.nn.relu(mm(f"l{i}", h) + B(f"l{i}"))

        # ---- fused feature|alpha head: one [33,32] matmul ----
        fa = mm("fa", h) + B("fa")                # [33, T] = [feature | alpha]
        feature = fa[0:NETWIDTH, :]
        alphaT = fa[NETWIDTH:NETWIDTH + 1, :]

        # ---- view head: stacked [feature | d | sin d | cos d], cam folded into bias ----
        stack_ref[SV_F:SV_F + NETWIDTH, :] = feature
        stack_ref[SV_D:SV_D + 3, :] = dT
        for k in range(MULTIRES_VIEWS):
            dk = dT * float(2 ** k)
            stack_ref[SV_SIN + 3 * k:SV_SIN + 3 * (k + 1), :] = jnp.sin(dk)
            stack_ref[SV_COS + 3 * k:SV_COS + 3 * (k + 1), :] = jnp.cos(dk)
        hv = jax.nn.relu(mm("view", stack_ref[0:VIEW_K_PAD, :]) + B("view"))
        rgbT = mm("rgb", hv) + B("rgb")           # [3, T]

        # ---- lane-dense (4, T) output block ----
        out_ref[0:3, :] = jax.nn.sigmoid(rgbT)
        out_ref[3:4, :] = _softplus_b10(alphaT)

    return kernel


# ------------------------------- wrapper --------------------------------------
def vanilla_nerf_forward(x, t_dirs, slab, layout, tile_n=None):
    """Fused forward: (x[N,3], t_dirs[N,3]) -> (rgb[N,3], sigma[N,1])."""
    n = x.shape[0]
    if tile_n is None:
        # Large tiles amortize the ~0.35us per-grid-step overhead; cap so the
        # "parallel" grid keeps >=2 steps whenever possible (two v7x TensorCores).
        tile_n = min(2048, max(128, pl.next_power_of_2(max(n, 2)) // 2))
    n_pad = pl.cdiv(n, tile_n) * tile_n

    # points-on-lanes, lane-dense I/O: one packed (6, N) input, (4, N) output
    xin = jnp.concatenate([x.T, t_dirs.T], axis=0)        # [6, N] f32
    if n_pad != n:
        xin = jnp.pad(xin, ((0, 0), (0, n_pad - n)))

    out = pl.pallas_call(
        _make_nerf_kernel(layout),
        out_shape=jax.ShapeDtypeStruct((4, n_pad), jnp.float32),
        grid_spec=pltpu.PrefetchScalarGridSpec(
            num_scalar_prefetch=0,
            grid=(n_pad // tile_n,),
            in_specs=[
                pl.BlockSpec((6, tile_n), lambda i: (0, i)),   # packed x | dirs
                pl.BlockSpec(slab.shape, lambda i: (0, 0)),    # bf16 weight slab (grid-invariant)
            ],
            out_specs=pl.BlockSpec((4, tile_n), lambda i: (0, i)),
            scratch_shapes=[pltpu.VMEM((STACK_ROWS, tile_n), jnp.float32)],
        ),
        compiler_params=pltpu.CompilerParams(
            dimension_semantics=("parallel",),
            vmem_limit_bytes=32 * 1024 * 1024),
    )(xin, slab)

    rgb = out[0:3, :n].T
    sigma = out[3:4, :n].T
    return rgb, sigma


# ------------------------------ JAX reference --------------------------------
def reference_forward(x, t_dirs, embedded_cam, params):
    x_emb = prepare_input(x, t_dirs, embedded_cam)
    pts, views = x_emb[:, :INPUT_CH], x_emb[:, INPUT_CH:]
    ws = [(params[2 * i], params[2 * i + 1]) for i in range(len(params) // 2)]
    pts_layers = ws[:NETDEPTH]
    (wf, bfeat), (wa, ba), (wv, bv), (wr, br) = ws[NETDEPTH:NETDEPTH + 4]
    h = pts
    for i, (w, b) in enumerate(pts_layers):
        h = jax.nn.relu(h @ w + b)
        if i in SKIPS:
            h = jnp.concatenate([pts, h], axis=-1)
    alpha = h @ wa + ba
    feature = h @ wf + bfeat
    hv = jax.nn.relu(jnp.concatenate([feature, views], -1) @ wv + bv)
    rgb = hv @ wr + br
    return jax.nn.sigmoid(rgb), _softplus_b10(alpha)


# ---------------------------------- main -------------------------------------
if __name__ == "__main__":
    key = jax.random.PRNGKey(0)
    kx, kd, kcam, kw = jax.random.split(key, 4)

    x = jax.random.uniform(kx, (N_POINTS, 3), jnp.float32)          # 3D points
    dirs = jax.random.normal(kd, (N_POINTS, 3), jnp.float32)
    t_dirs = dirs / jnp.linalg.norm(dirs, axis=-1, keepdims=True)   # view dirs

    # camera embedding table (nn.Embedding(trainset_length, input_ch_cam)), idx=0
    cam_table = jax.random.normal(kcam, (TRAINSET_LENGTH, INPUT_CH_CAM), jnp.float32)
    embedded_cam = cam_table[0]

    params = make_params(kw)
    slab, layout = pack_weights(params, embedded_cam)

    # full-tile case
    rgb, sigma = vanilla_nerf_forward(x, t_dirs, slab, layout)
    jax.block_until_ready((rgb, sigma))

    # Kernel matmuls run with bf16 operands; compare against a reference using the
    # same bf16-rounded weights (activations f32), at a bf16-appropriate tolerance.
    params_q = [_bf16_roundtrip(p) for p in params]
    rgb_ref, sigma_ref = reference_forward(x, t_dirs, embedded_cam, params_q)
    assert rgb.shape == (N_POINTS, 3) and sigma.shape == (N_POINTS, 1)
    assert jnp.allclose(rgb, rgb_ref, atol=5e-2, rtol=5e-2)
    assert jnp.allclose(sigma, sigma_ref, atol=5e-2, rtol=5e-2)

    # remainder case: N not a multiple of the tile (pad + slice in the wrapper)
    n2 = 200
    rgb2, sigma2 = vanilla_nerf_forward(x[:n2], t_dirs[:n2], slab, layout)
    jax.block_until_ready((rgb2, sigma2))
    rgb2_ref, sigma2_ref = reference_forward(x[:n2], t_dirs[:n2], embedded_cam, params_q)
    assert rgb2.shape == (n2, 3) and sigma2.shape == (n2, 1)
    assert jnp.allclose(rgb2, rgb2_ref, atol=5e-2, rtol=5e-2)
    assert jnp.allclose(sigma2, sigma2_ref, atol=5e-2, rtol=5e-2)

    print("KERNEL_OK")
</pallas_src>

<mosaic_0001>
module attributes {stable_mosaic.version = 11 : i64} {
  func.func @kernel(%arg0: i32, %arg1: memref<6x128xf32, #tpu.memory_space<vmem>>, %arg2: memref<336x128xbf16, #tpu.memory_space<vmem>>, %arg3: memref<4x128xf32, #tpu.memory_space<vmem>>, %arg4: memref<64x128xf32, #tpu.memory_space<vmem>>) attributes {dimension_semantics = [#tpu.dimension_semantics<parallel>], iteration_bounds = array<i64: 2>, scalar_prefetch = 0 : i64, scratch_operands = 1 : i64, tpu.core_type = #tpu.core_type<tc>, window_params = [{transform_indices = @transform_0, window_bounds = array<i64: 6, 128>}, {pipeline_mode = #tpu.pipeline_mode<synchronous>, transform_indices = @transform_1, window_bounds = array<i64: 336, 128>}, {transform_indices = @transform_2, window_bounds = array<i64: 4, 128>}]} {
    %c0 = arith.constant 0 : index
    %c0_0 = arith.constant 0 : index
    %0 = vector.load %arg1[%c0, %c0_0] : memref<6x128xf32, #tpu.memory_space<vmem>>, vector<6x128xf32>
    %1 = vector.extract_strided_slice %0 {offsets = [0, 0], sizes = [3, 128], strides = [1, 1]} : vector<6x128xf32> to vector<3x128xf32>
    %cst = arith.constant 5.000000e-01 : f32
    %2 = vector.broadcast %cst : f32 to vector<3x128xf32>
    %3 = arith.subf %1, %2 : vector<3x128xf32>
    %cst_1 = arith.constant 2.000000e+00 : f32
    %4 = vector.broadcast %cst_1 : f32 to vector<3x128xf32>
    %5 = arith.mulf %3, %4 : vector<3x128xf32>
    %6 = vector.extract_strided_slice %0 {offsets = [3, 0], sizes = [3, 128], strides = [1, 1]} : vector<6x128xf32> to vector<3x128xf32>
    %cst_2 = arith.constant 0.000000e+00 : f32
    %7 = vector.broadcast %cst_2 : f32 to vector<5x128xf32>
    %c27 = arith.constant 27 : index
    %c0_3 = arith.constant 0 : index
    %8 = vector.load %arg4[%c27, %c0_3] : memref<64x128xf32, #tpu.memory_space<vmem>>, vector<5x128xf32>
    tpu.vector_store %arg4[%c27, %c0_3], %7 {strides = array<i32>} : memref<64x128xf32, #tpu.memory_space<vmem>>, vector<5x128xf32>,
    %c0_4 = arith.constant 0 : index
    %c0_5 = arith.constant 0 : index
    %9 = vector.load %arg4[%c0_4, %c0_5] : memref<64x128xf32, #tpu.memory_space<vmem>>, vector<3x128xf32>
    tpu.vector_store %arg4[%c0_4, %c0_5], %5 {strides = array<i32>} : memref<64x128xf32, #tpu.memory_space<vmem>>, vector<3x128xf32>,
    %cst_6 = arith.constant 1.000000e+00 : f32
    %10 = vector.broadcast %cst_6 : f32 to vector<3x128xf32>
    %11 = arith.mulf %5, %10 : vector<3x128xf32>
    %12 = math.sin %11 : vector<3x128xf32>
    %c3 = arith.constant 3 : index
    %c0_7 = arith.constant 0 : index
    %13 = vector.load %arg4[%c3, %c0_7] : memref<64x128xf32, #tpu.memory_space<vmem>>, vector<3x128xf32>
    tpu.vector_store %arg4[%c3, %c0_7], %12 {strides = array<i32>} : memref<64x128xf32, #tpu.memory_space<vmem>>, vector<3x128xf32>,
    %14 = math.cos %11 : vector<3x128xf32>
    %c15 = arith.constant 15 : index
    %c0_8 = arith.constant 0 : index
    %15 = vector.load %arg4[%c15, %c0_8] : memref<64x128xf32, #tpu.memory_space<vmem>>, vector<3x128xf32>
    tpu.vector_store %arg4[%c15, %c0_8], %14 {strides = array<i32>} : memref<64x128xf32, #tpu.memory_space<vmem>>, vector<3x128xf32>,
    %cst_9 = arith.constant 2.000000e+00 : f32
    %16 = vector.broadcast %cst_9 : f32 to vector<3x128xf32>
    %17 = arith.mulf %5, %16 : vector<3x128xf32>
    %18 = math.sin %17 : vector<3x128xf32>
    %c6 = arith.constant 6 : index
    %c0_10 = arith.constant 0 : index
    %19 = vector.load %arg4[%c6, %c0_10] : memref<64x128xf32, #tpu.memory_space<vmem>>, vector<3x128xf32>
    tpu.vector_store %arg4[%c6, %c0_10], %18 {strides = array<i32>} : memref<64x128xf32, #tpu.memory_space<vmem>>, vector<3x128xf32>,
    %20 = math.cos %17 : vector<3x128xf32>
    %c18 = arith.constant 18 : index
    %c0_11 = arith.constant 0 : index
    %21 = vector.load %arg4[%c18, %c0_11] : memref<64x128xf32, #tpu.memory_space<vmem>>, vector<3x128xf32>
    tpu.vector_store %arg4[%c18, %c0_11], %20 {strides = array<i32>} : memref<64x128xf32, #tpu.memory_space<vmem>>, vector<3x128xf32>,
    %cst_12 = arith.constant 4.000000e+00 : f32
    %22 = vector.broadcast %cst_12 : f32 to vector<3x128xf32>
    %23 = arith.mulf %5, %22 : vector<3x128xf32>
    %24 = math.sin %23 : vector<3x128xf32>
    %c9 = arith.constant 9 : index
    %c0_13 = arith.constant 0 : index
    %25 = vector.load %arg4[%c9, %c0_13] : memref<64x128xf32, #tpu.memory_space<vmem>>, vector<3x128xf32>
    tpu.vector_store %arg4[%c9, %c0_13], %24 {strides = array<i32>} : memref<64x128xf32, #tpu.memory_space<vmem>>, vector<3x128xf32>,
    %26 = math.cos %23 : vector<3x128xf32>
    %c21 = arith.constant 21 : index
    %c0_14 = arith.constant 0 : index
    %27 = vector.load %arg4[%c21, %c0_14] : memref<64x128xf32, #tpu.memory_space<vmem>>, vector<3x128xf32>
    tpu.vector_store %arg4[%c21, %c0_14], %26 {strides = array<i32>} : memref<64x128xf32, #tpu.memory_space<vmem>>, vector<3x128xf32>,
    %cst_15 = arith.constant 8.000000e+00 : f32
    %28 = vector.broadcast %cst_15 : f32 to vector<3x128xf32>
    %29 = arith.mulf %5, %28 : vector<3x128xf32>
    %30 = math.sin %29 : vector<3x128xf32>
    %c12 = arith.constant 12 : index
    %c0_16 = arith.constant 0 : index
    %31 = vector.load %arg4[%c12, %c0_16] : memref<64x128xf32, #tpu.memory_space<vmem>>, vector<3x128xf32>
    tpu.vector_store %arg4[%c12, %c0_16], %30 {strides = array<i32>} : memref<64x128xf32, #tpu.memory_space<vmem>>, vector<3x128xf32>,
    %32 = math.cos %29 : vector<3x128xf32>
    %c24 = arith.constant 24 : index
    %c0_17 = arith.constant 0 : index
    %33 = vector.load %arg4[%c24, %c0_17] : memref<64x128xf32, #tpu.memory_space<vmem>>, vector<3x128xf32>
    tpu.vector_store %arg4[%c24, %c0_17], %32 {strides = array<i32>} : memref<64x128xf32, #tpu.memory_space<vmem>>, vector<3x128xf32>,
    %c0_18 = arith.constant 0 : index
    %c0_19 = arith.constant 0 : index
    %34 = vector.load %arg4[%c0_18, %c0_19] : memref<64x128xf32, #tpu.memory_space<vmem>>, vector<32x128xf32>
    %c0_20 = arith.constant 0 : index
    %c0_21 = arith.constant 0 : index
    %35 = vector.load %arg2[%c0_20, %c0_21] : memref<336x128xbf16, #tpu.memory_space<vmem>>, vector<32x32xbf16>
    %36 = arith.truncf %34 : vector<32x128xf32> to vector<32x128xbf16>
    %cst_22 = arith.constant dense<0.000000e+00> : vector<32x128xf32>
    %37 = tpu.matmul %35, %36, %cst_22 {dimension_numbers = #tpu.dot_dimension_numbers<[1], [0], [0], [1], [0, 0, 1, 1], [], []>} : vector<32x32xbf16>, vector<32x128xbf16>, vector<32x128xf32> -> vector<32x128xf32>
    %c0_23 = arith.constant 0 : index
    %c127 = arith.constant 127 : index
    %38 = vector.load %arg2[%c0_23, %c127] : memref<336x128xbf16, #tpu.memory_space<vmem>>, vector<32x1xbf16>
    %39 = arith.extf %38 : vector<32x1xbf16> to vector<32x1xf32>
    %40 = vector.broadcast %39 : vector<32x1xf32> to vector<32x128xf32>
    %41 = arith.addf %37, %40 : vector<32x128xf32>
    %cst_24 = arith.constant 0.000000e+00 : f32
    %42 = vector.broadcast %cst_24 : f32 to vector<32x128xf32>
    %43 = arith.maximumf %41, %42 : vector<32x128xf32>
    %c32 = arith.constant 32 : index
    %c0_25 = arith.constant 0 : index
    %44 = vector.load %arg2[%c32, %c0_25] : memref<336x128xbf16, #tpu.memory_space<vmem>>, vector<32x32xbf16>
    %45 = arith.truncf %43 : vector<32x128xf32> to vector<32x128xbf16>
    %cst_26 = arith.constant dense<0.000000e+00> : vector<32x128xf32>
    %46 = tpu.matmul %44, %45, %cst_26 {dimension_numbers = #tpu.dot_dimension_numbers<[1], [0], [0], [1], [0, 0, 1, 1], [], []>} : vector<32x32xbf16>, vector<32x128xbf16>, vector<32x128xf32> -> vector<32x128xf32>
    %c32_27 = arith.constant 32 : index
    %c127_28 = arith.constant 127 : index
    %47 = vector.load %arg2[%c32_27, %c127_28] : memref<336x128xbf16, #tpu.memory_space<vmem>>, vector<32x1xbf16>
    %48 = arith.extf %47 : vector<32x1xbf16> to vector<32x1xf32>
    %49 = vector.broadcast %48 : vector<32x1xf32> to vector<32x128xf32>
    %50 = arith.addf %46, %49 : vector<32x128xf32>
    %cst_29 = arith.constant 0.000000e+00 : f32
    %51 = vector.broadcast %cst_29 : f32 to vector<32x128xf32>
    %52 = arith.maximumf %50, %51 : vector<32x128xf32>
    %c64 = arith.constant 64 : index
    %c0_30 = arith.constant 0 : index
    %53 = vector.load %arg2[%c64, %c0_30] : memref<336x128xbf16, #tpu.memory_space<vmem>>, vector<32x32xbf16>
    %54 = arith.truncf %52 : vector<32x128xf32> to vector<32x128xbf16>
    %cst_31 = arith.constant dense<0.000000e+00> : vector<32x128xf32>
    %55 = tpu.matmul %53, %54, %cst_31 {dimension_numbers = #tpu.dot_dimension_numbers<[1], [0], [0], [1], [0, 0, 1, 1], [], []>} : vector<32x32xbf16>, vector<32x128xbf16>, vector<32x128xf32> -> vector<32x128xf32>
    %c64_32 = arith.constant 64 : index
    %c127_33 = arith.constant 127 : index
    %56 = vector.load %arg2[%c64_32, %c127_33] : memref<336x128xbf16, #tpu.memory_space<vmem>>, vector<32x1xbf16>
    %57 = arith.extf %56 : vector<32x1xbf16> to vector<32x1xf32>
    %58 = vector.broadcast %57 : vector<32x1xf32> to vector<32x128xf32>
    %59 = arith.addf %55, %58 : vector<32x128xf32>
    %cst_34 = arith.constant 0.000000e+00 : f32
    %60 = vector.broadcast %cst_34 : f32 to vector<32x128xf32>
    %61 = arith.maximumf %59, %60 : vector<32x128xf32>
    %c96 = arith.constant 96 : index
    %c0_35 = arith.constant 0 : index
    %62 = vector.load %arg2[%c96, %c0_35] : memref<336x128xbf16, #tpu.memory_space<vmem>>, vector<32x32xbf16>
    %63 = arith.truncf %61 : vector<32x128xf32> to vector<32x128xbf16>
    %cst_36 = arith.constant dense<0.000000e+00> : vector<32x128xf32>
    %64 = tpu.matmul %62, %63, %cst_36 {dimension_numbers = #tpu.dot_dimension_numbers<[1], [0], [0], [1], [0, 0, 1, 1], [], []>} : vector<32x32xbf16>, vector<32x128xbf16>, vector<32x128xf32> -> vector<32x128xf32>
    %c96_37 = arith.constant 96 : index
    %c127_38 = arith.constant 127 : index
    %65 = vector.load %arg2[%c96_37, %c127_38] : memref<336x128xbf16, #tpu.memory_space<vmem>>, vector<32x1xbf16>
    %66 = arith.extf %65 : vector<32x1xbf16> to vector<32x1xf32>
    %67 = vector.broadcast %66 : vector<32x1xf32> to vector<32x128xf32>
    %68 = arith.addf %64, %67 : vector<32x128xf32>
    %cst_39 = arith.constant 0.000000e+00 : f32
    %69 = vector.broadcast %cst_39 : f32 to vector<32x128xf32>
    %70 = arith.maximumf %68, %69 : vector<32x128xf32>
    %c128 = arith.constant 128 : index
    %c0_40 = arith.constant 0 : index
    %71 = vector.load %arg2[%c128, %c0_40] : memref<336x128xbf16, #tpu.memory_space<vmem>>, vector<32x32xbf16>
    %72 = arith.truncf %70 : vector<32x128xf32> to vector<32x128xbf16>
    %cst_41 = arith.constant dense<0.000000e+00> : vector<32x128xf32>
    %73 = tpu.matmul %71, %72, %cst_41 {dimension_numbers = #tpu.dot_dimension_numbers<[1], [0], [0], [1], [0, 0, 1, 1], [], []>} : vector<32x32xbf16>, vector<32x128xbf16>, vector<32x128xf32> -> vector<32x128xf32>
    %c128_42 = arith.constant 128 : index
    %c127_43 = arith.constant 127 : index
    %74 = vector.load %arg2[%c128_42, %c127_43] : memref<336x128xbf16, #tpu.memory_space<vmem>>, vector<32x1xbf16>
    %75 = arith.extf %74 : vector<32x1xbf16> to vector<32x1xf32>
    %76 = vector.broadcast %75 : vector<32x1xf32> to vector<32x128xf32>
    %77 = arith.addf %73, %76 : vector<32x128xf32>
    %cst_44 = arith.constant 0.000000e+00 : f32
    %78 = vector.broadcast %cst_44 : f32 to vector<32x128xf32>
    %79 = arith.maximumf %77, %78 : vector<32x128xf32>
    %c32_45 = arith.constant 32 : index
    %c0_46 = arith.constant 0 : index
    %80 = vector.load %arg4[%c32_45, %c0_46] : memref<64x128xf32, #tpu.memory_space<vmem>>, vector<32x128xf32>
    tpu.vector_store %arg4[%c32_45, %c0_46], %79 {strides = array<i32>} : memref<64x128xf32, #tpu.memory_space<vmem>>, vector<32x128xf32>,
    %c0_47 = arith.constant 0 : index
    %c0_48 = arith.constant 0 : index
    %81 = vector.load %arg4[%c0_47, %c0_48] : memref<64x128xf32, #tpu.memory_space<vmem>>, vector<64x128xf32>
    %c160 = arith.constant 160 : index
    %c0_49 = arith.constant 0 : index
    %82 = vector.load %arg2[%c160, %c0_49] : memref<336x128xbf16, #tpu.memory_space<vmem>>, vector<32x64xbf16>
    %83 = arith.truncf %81 : vector<64x128xf32> to vector<64x128xbf16>
    %cst_50 = arith.constant dense<0.000000e+00> : vector<32x128xf32>
    %84 = tpu.matmul %82, %83, %cst_50 {dimension_numbers = #tpu.dot_dimension_numbers<[1], [0], [0], [1], [0, 0, 1, 1], [], []>} : vector<32x64xbf16>, vector<64x128xbf16>, vector<32x128xf32> -> vector<32x128xf32>
    %c160_51 = arith.constant 160 : index
    %c127_52 = arith.constant 127 : index
    %85 = vector.load %arg2[%c160_51, %c127_52] : memref<336x128xbf16, #tpu.memory_space<vmem>>, vector<32x1xbf16>
    %86 = arith.extf %85 : vector<32x1xbf16> to vector<32x1xf32>
    %87 = vector.broadcast %86 : vector<32x1xf32> to vector<32x128xf32>
    %88 = arith.addf %84, %87 : vector<32x128xf32>
    %cst_53 = arith.constant 0.000000e+00 : f32
    %89 = vector.broadcast %cst_53 : f32 to vector<32x128xf32>
    %90 = arith.maximumf %88, %89 : vector<32x128xf32>
    %c192 = arith.constant 192 : index
    %c0_54 = arith.constant 0 : index
    %91 = vector.load %arg2[%c192, %c0_54] : memref<336x128xbf16, #tpu.memory_space<vmem>>, vector<32x32xbf16>
    %92 = arith.truncf %90 : vector<32x128xf32> to vector<32x128xbf16>
    %cst_55 = arith.constant dense<0.000000e+00> : vector<32x128xf32>
    %93 = tpu.matmul %91, %92, %cst_55 {dimension_numbers = #tpu.dot_dimension_numbers<[1], [0], [0], [1], [0, 0, 1, 1], [], []>} : vector<32x32xbf16>, vector<32x128xbf16>, vector<32x128xf32> -> vector<32x128xf32>
    %c192_56 = arith.constant 192 : index
    %c127_57 = arith.constant 127 : index
    %94 = vector.load %arg2[%c192_56, %c127_57] : memref<336x128xbf16, #tpu.memory_space<vmem>>, vector<32x1xbf16>
    %95 = arith.extf %94 : vector<32x1xbf16> to vector<32x1xf32>
    %96 = vector.broadcast %95 : vector<32x1xf32> to vector<32x128xf32>
    %97 = arith.addf %93, %96 : vector<32x128xf32>
    %cst_58 = arith.constant 0.000000e+00 : f32
    %98 = vector.broadcast %cst_58 : f32 to vector<32x128xf32>
    %99 = arith.maximumf %97, %98 : vector<32x128xf32>
    %c224 = arith.constant 224 : index
    %c0_59 = arith.constant 0 : index
    %100 = vector.load %arg2[%c224, %c0_59] : memref<336x128xbf16, #tpu.memory_space<vmem>>, vector<32x32xbf16>
    %101 = arith.truncf %99 : vector<32x128xf32> to vector<32x128xbf16>
    %cst_60 = arith.constant dense<0.000000e+00> : vector<32x128xf32>
    %102 = tpu.matmul %100, %101, %cst_60 {dimension_numbers = #tpu.dot_dimension_numbers<[1], [0], [0], [1], [0, 0, 1, 1], [], []>} : vector<32x32xbf16>, vector<32x128xbf16>, vector<32x128xf32> -> vector<32x128xf32>
    %c224_61 = arith.constant 224 : index
    %c127_62 = arith.constant 127 : index
    %103 = vector.load %arg2[%c224_61, %c127_62] : memref<336x128xbf16, #tpu.memory_space<vmem>>, vector<32x1xbf16>
    %104 = arith.extf %103 : vector<32x1xbf16> to vector<32x1xf32>
    %105 = vector.broadcast %104 : vector<32x1xf32> to vector<32x128xf32>
    %106 = arith.addf %102, %105 : vector<32x128xf32>
    %cst_63 = arith.constant 0.000000e+00 : f32
    %107 = vector.broadcast %cst_63 : f32 to vector<32x128xf32>
    %108 = arith.maximumf %106, %107 : vector<32x128xf32>
    %c256 = arith.constant 256 : index
    %c0_64 = arith.constant 0 : index
    %109 = vector.load %arg2[%c256, %c0_64] : memref<336x128xbf16, #tpu.memory_space<vmem>>, vector<33x32xbf16>
    %110 = arith.truncf %108 : vector<32x128xf32> to vector<32x128xbf16>
    %cst_65 = arith.constant dense<0.000000e+00> : vector<33x128xf32>
    %111 = tpu.matmul %109, %110, %cst_65 {dimension_numbers = #tpu.dot_dimension_numbers<[1], [0], [0], [1], [0, 0, 1, 1], [], []>} : vector<33x32xbf16>, vector<32x128xbf16>, vector<33x128xf32> -> vector<33x128xf32>
    %c256_66 = arith.constant 256 : index
    %c127_67 = arith.constant 127 : index
    %112 = vector.load %arg2[%c256_66, %c127_67] : memref<336x128xbf16, #tpu.memory_space<vmem>>, vector<33x1xbf16>
    %113 = arith.extf %112 : vector<33x1xbf16> to vector<33x1xf32>
    %114 = vector.broadcast %113 : vector<33x1xf32> to vector<33x128xf32>
    %115 = arith.addf %111, %114 : vector<33x128xf32>
    %116 = vector.extract_strided_slice %115 {offsets = [0, 0], sizes = [32, 128], strides = [1, 1]} : vector<33x128xf32> to vector<32x128xf32>
    %117 = vector.extract_strided_slice %115 {offsets = [32, 0], sizes = [1, 128], strides = [1, 1]} : vector<33x128xf32> to vector<1x128xf32>
    %c0_68 = arith.constant 0 : index
    %c0_69 = arith.constant 0 : index
    %118 = vector.load %arg4[%c0_68, %c0_69] : memref<64x128xf32, #tpu.memory_space<vmem>>, vector<32x128xf32>
    tpu.vector_store %arg4[%c0_68, %c0_69], %116 {strides = array<i32>} : memref<64x128xf32, #tpu.memory_space<vmem>>, vector<32x128xf32>,
    %c32_70 = arith.constant 32 : index
    %c0_71 = arith.constant 0 : index
    %119 = vector.load %arg4[%c32_70, %c0_71] : memref<64x128xf32, #tpu.memory_space<vmem>>, vector<3x128xf32>
    tpu.vector_store %arg4[%c32_70, %c0_71], %6 {strides = array<i32>} : memref<64x128xf32, #tpu.memory_space<vmem>>, vector<3x128xf32>,
    %cst_72 = arith.constant 1.000000e+00 : f32
    %120 = vector.broadcast %cst_72 : f32 to vector<3x128xf32>
    %121 = arith.mulf %6, %120 : vector<3x128xf32>
    %122 = math.sin %121 : vector<3x128xf32>
    %c35 = arith.constant 35 : index
    %c0_73 = arith.constant 0 : index
    %123 = vector.load %arg4[%c35, %c0_73] : memref<64x128xf32, #tpu.memory_space<vmem>>, vector<3x128xf32>
    tpu.vector_store %arg4[%c35, %c0_73], %122 {strides = array<i32>} : memref<64x128xf32, #tpu.memory_space<vmem>>, vector<3x128xf32>,
    %124 = math.cos %121 : vector<3x128xf32>
    %c41 = arith.constant 41 : index
    %c0_74 = arith.constant 0 : index
    %125 = vector.load %arg4[%c41, %c0_74] : memref<64x128xf32, #tpu.memory_space<vmem>>, vector<3x128xf32>
    tpu.vector_store %arg4[%c41, %c0_74], %124 {strides = array<i32>} : memref<64x128xf32, #tpu.memory_space<vmem>>, vector<3x128xf32>,
    %cst_75 = arith.constant 2.000000e+00 : f32
    %126 = vector.broadcast %cst_75 : f32 to vector<3x128xf32>
    %127 = arith.mulf %6, %126 : vector<3x128xf32>
    %128 = math.sin %127 : vector<3x128xf32>
    %c38 = arith.constant 38 : index
    %c0_76 = arith.constant 0 : index
    %129 = vector.load %arg4[%c38, %c0_76] : memref<64x128xf32, #tpu.memory_space<vmem>>, vector<3x128xf32>
    tpu.vector_store %arg4[%c38, %c0_76], %128 {strides = array<i32>} : memref<64x128xf32, #tpu.memory_space<vmem>>, vector<3x128xf32>,
    %130 = math.cos %127 : vector<3x128xf32>
    %c44 = arith.constant 44 : index
    %c0_77 = arith.constant 0 : index
    %131 = vector.load %arg4[%c44, %c0_77] : memref<64x128xf32, #tpu.memory_space<vmem>>, vector<3x128xf32>
    tpu.vector_store %arg4[%c44, %c0_77], %130 {strides = array<i32>} : memref<64x128xf32, #tpu.memory_space<vmem>>, vector<3x128xf32>,
    %c0_78 = arith.constant 0 : index
    %c0_79 = arith.constant 0 : index
    %132 = vector.load %arg4[%c0_78, %c0_79] : memref<64x128xf32, #tpu.memory_space<vmem>>, vector<48x128xf32>
    %c304 = arith.constant 304 : index
    %c0_80 = arith.constant 0 : index
    %133 = vector.load %arg2[%c304, %c0_80] : memref<336x128xbf16, #tpu.memory_space<vmem>>, vector<16x48xbf16>
    %134 = arith.truncf %132 : vector<48x128xf32> to vector<48x128xbf16>
    %cst_81 = arith.constant dense<0.000000e+00> : vector<16x128xf32>
    %135 = tpu.matmul %133, %134, %cst_81 {dimension_numbers = #tpu.dot_dimension_numbers<[1], [0], [0], [1], [0, 0, 1, 1], [], []>} : vector<16x48xbf16>, vector<48x128xbf16>, vector<16x128xf32> -> vector<16x128xf32>
    %c304_82 = arith.constant 304 : index
    %c127_83 = arith.constant 127 : index
    %136 = vector.load %arg2[%c304_82, %c127_83] : memref<336x128xbf16, #tpu.memory_space<vmem>>, vector<16x1xbf16>
    %137 = arith.extf %136 : vector<16x1xbf16> to vector<16x1xf32>
    %138 = vector.broadcast %137 : vector<16x1xf32> to vector<16x128xf32>
    %139 = arith.addf %135, %138 : vector<16x128xf32>
    %cst_84 = arith.constant 0.000000e+00 : f32
    %140 = vector.broadcast %cst_84 : f32 to vector<16x128xf32>
    %141 = arith.maximumf %139, %140 : vector<16x128xf32>
    %c320 = arith.constant 320 : index
    %c0_85 = arith.constant 0 : index
    %142 = vector.load %arg2[%c320, %c0_85] : memref<336x128xbf16, #tpu.memory_space<vmem>>, vector<3x16xbf16>
    %143 = arith.truncf %141 : vector<16x128xf32> to vector<16x128xbf16>
    %cst_86 = arith.constant dense<0.000000e+00> : vector<3x128xf32>
    %144 = tpu.matmul %142, %143, %cst_86 {dimension_numbers = #tpu.dot_dimension_numbers<[1], [0], [0], [1], [0, 0, 1, 1], [], []>} : vector<3x16xbf16>, vector<16x128xbf16>, vector<3x128xf32> -> vector<3x128xf32>
    %c320_87 = arith.constant 320 : index
    %c127_88 = arith.constant 127 : index
    %145 = vector.load %arg2[%c320_87, %c127_88] : memref<336x128xbf16, #tpu.memory_space<vmem>>, vector<3x1xbf16>
    %146 = arith.extf %145 : vector<3x1xbf16> to vector<3x1xf32>
    %147 = vector.broadcast %146 : vector<3x1xf32> to vector<3x128xf32>
    %148 = arith.addf %144, %147 : vector<3x128xf32>
    %149 = arith.negf %148 : vector<3x128xf32>
    %150 = math.exp %149 : vector<3x128xf32>
    %cst_89 = arith.constant 1.000000e+00 : f32
    %151 = vector.broadcast %cst_89 : f32 to vector<3x128xf32>
    %152 = arith.addf %151, %150 : vector<3x128xf32>
    %153 = arith.divf %151, %152 : vector<3x128xf32>
    %c0_90 = arith.constant 0 : index
    %c0_91 = arith.constant 0 : index
    %154 = vector.load %arg3[%c0_90, %c0_91] : memref<4x128xf32, #tpu.memory_space<vmem>>, vector<3x128xf32>
    tpu.vector_store %arg3[%c0_90, %c0_91], %153 {strides = array<i32>} : memref<4x128xf32, #tpu.memory_space<vmem>>, vector<3x128xf32>,
    %cst_92 = arith.constant 1.000000e+01 : f32
    %155 = vector.broadcast %cst_92 : f32 to vector<1x128xf32>
    %156 = arith.mulf %155, %117 : vector<1x128xf32>
    %cst_93 = arith.constant 2.000000e+01 : f32
    %157 = vector.broadcast %cst_93 : f32 to vector<1x128xf32>
    %158 = arith.cmpf ogt, %156, %157 : vector<1x128xf32>
    %cst_94 = arith.constant 2.000000e+01 : f32
    %159 = vector.broadcast %cst_94 : f32 to vector<1x128xf32>
    %160 = arith.minimumf %156, %159 : vector<1x128xf32>
    %161 = math.exp %160 : vector<1x128xf32>
    %162 = math.log1p %161 : vector<1x128xf32>
    %cst_95 = arith.constant 1.000000e+01 : f32
    %163 = vector.broadcast %cst_95 : f32 to vector<1x128xf32>
    %164 = arith.divf %162, %163 : vector<1x128xf32>
    %165 = arith.select %158, %117, %164 : vector<1x128xi1>, vector<1x128xf32>
    %c3_96 = arith.constant 3 : index
    %c0_97 = arith.constant 0 : index
    %166 = vector.load %arg3[%c3_96, %c0_97] : memref<4x128xf32, #tpu.memory_space<vmem>>, vector<1x128xf32>
    tpu.vector_store %arg3[%c3_96, %c0_97], %165 {strides = array<i32>} : memref<4x128xf32, #tpu.memory_space<vmem>>, vector<1x128xf32>,
    return
  }
  func.func @transform_0(%arg0: i32) -> (i32, i32) {
    %c0_i32 = arith.constant 0 : i32
    %c0_i32_0 = arith.constant 0 : i32
    return %c0_i32, %arg0 : i32, i32
  }
  func.func @transform_1(%arg0: i32) -> (i32, i32) {
    %c0_i32 = arith.constant 0 : i32
    %c0_i32_0 = arith.constant 0 : i32
    %c0_i32_1 = arith.constant 0 : i32
    return %c0_i32, %c0_i32_0 : i32, i32
  }
  func.func @transform_2(%arg0: i32) -> (i32, i32) {
    %c0_i32 = arith.constant 0 : i32
    %c0_i32_0 = arith.constant 0 : i32
    return %c0_i32, %arg0 : i32, i32
  }
}

</mosaic_0001>

<bundles_post_ra>
// kernel: tpu_custom_call.1
= control target key start
LH: loop header
LB: loop body
LE: loop exit
PB: predicated region body
PF: predicated region fallthrough
CT: control target
= control target key end

     0   :  { %7 = vsyncpa [#allocation4], 0  ;;  %s4143_s0 = inlined_call_operand.hbm [shape: f32[6,256], index: 0, kind: input, shape index: {}]   ;;  %s4144_s1 = inlined_call_operand.hbm [shape: bf16[336,128], index: 1, kind: input, shape index: {}]   ;;  %s4145_s2 = inlined_call_operand.hbm [shape: f32[4,256], index: 2, kind: output, shape index: {}]  }
   0x1   :  { %9 = vsyncpa [#allocation4 + $0x1], 0 }
   0x2   :  { %10 = vsyncpa [#allocation7], 0 }
   0x3   :  { %11 = vsyncpa [#allocation5], 0 }
   0x4   :  { %13 = vsyncpa [#allocation5 + $0x1], 0  ;;  %s3329_s9 = smov 0   ;;  %s3331_s10 = smov 0  }
   0x5   :  { %s3333_s11 = smov 0   ;;  %s3335_s12 = smov 0  }
   0x6 LB: > { %s3350_s13 = sadd.s32 4294967295, %s3298_s12   ;;  %s2616_s14 = sadd.s32 4294967294, %s3298_s12   ;;  %s3298_s12 = sphi %s3335_s12, %s4169_s12   ;;  %s3294_s11 = sphi %s3333_s11, %s4168_s11   ;;  %s3290_s10 = sphi %s3331_s10, %s4167_s10   ;;  %s3286_s9 = sphi %s3329_s9, %s4166_s9  }
   0x7   : > { %p39_p0 = scmp.ne.s32.totalorder %s3290_s10, %s3286_s9  ;;  %p4146_p1 = scmp.eq.s32.totalorder %s3350_s13, 0 }
   0x8   : > { %p90_p3 = scmp.eq.s32.totalorder %s2616_s14, 1  ;;  %p2617_p5 = scmp.ge.s32.totalorder %s3298_s12, 1 }
   0x9   : > { %p3359_p4 = por %p4146_p1, %p39_p0  ;;  %p97_p7 = scmp.lt.s32.totalorder %s3298_s12, 3 }
   0xa   : > { %p3364_p6 = por %p90_p3, %p39_p0  ;;  %s3300_s18 = smov [#allocation6]  }
   0xb   : > { %s4149_s15 = scalar_select %p3359_p4, 1, 0 }
   0xc   : > { %s4150_s16 = scalar_select %p3364_p6, 1, 0 }
   0xd   : > { %p3369_p8 = pnand %p2617_p5, %p97_p7  ;;  %s109_s19 = sshll.u32 %s3300_s18, 4  ;;  %s3373_s19 = int_to_ptr.vmem [resolvable:$true] %s109_s19 }
   0xe   : > { %s3385_s21 = sadd.s32 1, %s3298_s12   ;;  %s26_s22 = sadd.s32 1, %s3294_s11 }
   0xf   : > { %s4151_s17 = scalar_select %p3369_p8, 1, 0 }
  0x10   : > { %p2898_p9 = pneg %p3369_p8  ;;  %s23_s23 = ssub.s32 %s3298_s12, %s3385_s21 }
  0x11   : > { %s3170_s26 = scalar_lea.hbm %s4144_s1, 2688 }
  0x12   : > { %p3380_p11 = pnand %p2898_p9, %p4146_p1  ;;  %p3171_p12 = scmp.ne.s32.totalorder %s4144_s1, %s3170_s26 }
  0x13   : > { %p3177_p5 = scmp.lt.u32.totalorder %s3170_s26, %s4144_s1 }
  0x14   : > { %p3172_p13 = pneg %p3380_p11 }
  0x16   : > { %p3173_p0 = pnand %p3172_p13, %p3171_p12 }
  0x18   : > { %p3174_p3 = pneg %p3173_p0 }
  0x1a   : > { %p3179_p7 = pnand %p3177_p5, %p3174_p3 }
  0x1c   : > { %3182 = shalt.err (!%p3179_p7)
}
  0x1d   : > { %s3183_s3 = scalar_lea.vmem %s3373_s19, 2688  ;;  %p3191_p2 = scmp.lt.s32.totalorder %s3373_s19, %s3373_s19 }
  0x1e   : > { %p3184_p9 = scmp.ne.s32.totalorder %s3373_s19, %s3183_s3  ;;  %p3192_p6 = scmp.lt.s32.totalorder %s3183_s3, %s3183_s3 }
  0x20   : > { %p3186_p10 = pnand %p3184_p9, %p3172_p13  ;;  %p3193_p4 = por %p3192_p6, %p3191_p2 }
  0x22   : > { %p3187_p1 = pneg %p3186_p10 }
  0x24   : > { %p3194_p8 = pnand %p3193_p4, %p3187_p1 }
  0x26   : > { %3197 = shalt.err (!%p3194_p8)
}
  0x27   : > { %s3301_s4 = smov 64   ;;  %s3302_s5 = smov 4  }
  0x28   : > { %2901 = dma.hbm_to_vmem [thread:$0]  (!%p3380_p11), %s4144_s1, 2688, %s3373_s19, [#allocation7], %s3301_s4, %s3301_s4, %s3302_s5  }
  0x29   : > { %p24_p2 = scmp.eq.s32.totalorder %s23_s23, 0  ;;  %p33_p1 = scmp.ne.s32.totalorder %s3294_s11, %s3290_s10 }
  0x2a   : > { %p34_p4 = scmp.eq.s32.totalorder %s3298_s12, 0  ;;  %p2911_p6 = scmp.lt.s32.totalorder %s3298_s12, 2 }
  0x2b   : > { %s3416_s8 = scalar_select %p24_p2, %s3294_s11, %s26_s22  }
  0x2c   : > { %p35_p8 = por %p34_p4, %p33_p1  ;;  %p4153_p10 = scmp.eq.s32.totalorder %s3350_s13, 1 }
  0x2d   : > { %s123_s18 = sand.u32 1, %s3294_s11   ;;  %s2621_s24 = sshll.u32 %s3298_s12, 7 }
  0x2e   : > { %p3420_p12 = por %p4153_p10, %p33_p1  ;;  %s2620_s25 = sshll.u32 %s123_s18, 3 }
  0x2f   : > { %s3429_s27 = scalar_lea.hbm %s4143_s0, %s2621_s24  ;;  %s127_s19 = scalar_lea.vmem [#allocation3], %s2620_s25 }
  0x30   : > { %s134_s22 = sshll.u32 %s127_s19, 4  ;;  %p3431_p11 = pnand %p2911_p6, %p35_p8  ;;  %s3435_s22 = int_to_ptr.vmem [resolvable:$true] %s134_s22 }
  0x31   : > { %s124_s28 = scalar_lea.sflag [#allocation4], %s123_s18  ;;  %s3198_s29 = scalar_lea.hbm %s3429_s27, 128 }
  0x32   : > { %p3199_p13 = scmp.ne.s32.totalorder %s3429_s27, %s3198_s29  ;;  %p3200_p0 = pneg %p3431_p11 }
  0x33   : > { %s3203_s4 = scalar_lea.hbm %s4143_s0, 256  ;;  %p3204_p7 = scmp.lt.u32.totalorder %s3429_s27, %s4143_s0 }
  0x34   : > { %p3201_p3 = pnand %p3200_p0, %p3199_p13  ;;  %p3205_p9 = scmp.lt.u32.totalorder %s3203_s4, %s3198_s29 }
  0x35   : > { %p3207_p1 = scmp.lt.u32.totalorder %s3198_s29, %s3429_s27 }
  0x36   : > { %p3202_p5 = pneg %p3201_p3  ;;  %p3206_p2 = por %p3205_p9, %p3204_p7 }
  0x38   : > { %p3208_p4 = por %p3207_p1, %p3206_p2 }
  0x3a   : > { %p3209_p6 = pnand %p3208_p4, %p3202_p5 }
  0x3c   : > { %3212 = shalt.err (!%p3209_p6)
}
  0x3d   : > { %s3213_s7 = scalar_lea.vmem %s3435_s22, 128  ;;  %s3303_s18 = smov [#allocation3]  }
  0x3e   : > { %p3214_p8 = scmp.ne.s32.totalorder %s3435_s22, %s3213_s7  ;;  %s3218_s24 = sshll.u32 %s3303_s18, 4  ;;  %s3219_s24 = int_to_ptr.vmem [resolvable:$false] %s3218_s24 }
  0x3f   : > { %s3220_s25 = scalar_lea.vmem %s3219_s24, 256  ;;  %p3221_p3 = scmp.lt.s32.totalorder %s3435_s22, %s3219_s24 }
  0x40   : > { %p3216_p10 = pnand %p3214_p8, %p3200_p0  ;;  %p3222_p7 = scmp.lt.s32.totalorder %s3220_s25, %s3213_s7 }
  0x42   : > { %p3217_p13 = pneg %p3216_p10  ;;  %p3223_p9 = por %p3222_p7, %p3221_p3 }
  0x44   : > { %p3224_p2 = pnand %p3223_p9, %p3217_p13 }
  0x46   : > { %3227 = shalt.err (!%p3224_p2)
}
  0x47   : > { %2905 = dma.hbm_to_vmem [thread:$0]  (!%p3431_p11), %s3429_s27, 128, %s3435_s22, %s124_s28  }
  0x48   : > { %p4156_p5 = scmp.ne.s32.totalorder %s4151_s17, 0 }
  0x49   : > { %s3465_s20 = sand.u32 (!%p4156_p5), 1, %s3290_s10   ;;  %p4157_p0 = scmp.ne.s32.totalorder (!%p4156_p5), %s4149_s15, 0 }
  0x4a   : > { %143 = sbr.rel (%p4156_p5) target bundleno = 2796 (0xaec), region = 28  ;;  %s2623_s26 = sshll.u32 (!%p4156_p5), %s3465_s20, 3 }
  0x4b   : > { %s146_s19 = scalar_lea.sflag (!%p4156_p5), [#allocation4], %s3465_s20  ;;  %s3469_s29 = scalar_lea.vmem (!%p4156_p5), [#allocation3], %s2623_s26 }
  0x51   : > { %3273 = dma.done.wait (%p4157_p0), %s146_s19, 128  }
  0x52   : > { %3275 = vsyncadd (%p4157_p0), %s146_s19, 4294967168  ;;  %p4158_p11 = scmp.eq.s32.totalorder %s3350_s13, 0 }
  0x54   : > { %3277 = dma.done.wait (%p4158_p11), [#allocation7], 2688   ;;  %p4159_p1 = pmov %p4158_p11 }
  0x55   : > { %v175_v0 = vld [vmem:[%s3469_s29] sm:$0x3f]  ;;  %v3304_v29 = vmov 683565275   ;;  %v3305_v31 = vmov 2475754826  }
  0x56   : > { %3279 = vsyncadd (%p4159_p1), [#allocation7], 4294964608  ;;  %v2626_v1 = vadd.f32 -0.5, %v175_v0  ;;  %v3306_v33 = vmov 2131351028   ;;  %s2625_s15 = sshll.u32 %s3465_s20, 2 }
  0x57   : > { %v3307_v35 = vmov 2102212464   ;;  %v3308_v37 = vmov 920167782   ;;  %v3309_v44 = vmov 1326507024  }
  0x58   : > { %v3480_v2 = vmul.f32 2.0, %v2626_v1  ;;  %s4090_s17 = scalar_lea.vmem [#allocation8], %s2625_s15  ;;  %s2718_s27 = sshll.u32 %s3350_s13, 6 }
  0x59   : > { %s2536_s22 = sshll.u32 %s4090_s17, 4  ;;  %s4098_s30 = scalar_lea.hbm %s4145_s2, %s2718_s27  ;;  %s4100_s22 = int_to_ptr.vmem [resolvable:$true] %s2536_s22 }
  0x5a   : > { %179 = vst [vmem:[#allocation2] sm:$0x7] %v3480_v2  ;;  %v180_v3 = vand.u32 2147483647, %v3480_v2  ;;  %v183_v4 = vand.u32 2139095040, %v3480_v2  ;;  %v3486_v5 = vmul.f32 2.0, %v3480_v2 }
  0x5b   : > { %v3489_v6 = vmul.f32 4.0, %v3480_v2  ;;  %vm182_vm13 = vcmp.lt.s32.totalorder %v3480_v2, 0  ;;  %s2523_s3 = scalar_lea.sflag [#allocation5], %s3465_s20  ;;  %s3228_s4 = scalar_lea.vmem %s4100_s22, 64 }
  0x5c   : > { %v184_v7 = vshrl.u32 %v183_v4, 23  ;;  %v187_v8 = vand.u32 8388607, %v180_v3  ;;  %v390_v9 = vand.u32 2147483647, %v3486_v5  ;;  %v393_v10 = vand.u32 2139095040, %v3486_v5  ;;  %p3229_p4 = scmp.ne.s32.totalorder %s4100_s22, %s3228_s4 }
  0x5d   : > { %v603_v14 = vand.u32 2139095040, %v3489_v6  ;;  %v600_v24 = vand.u32 2147483647, %v3489_v6  ;;  %vm3583_vm14 = vcmp.le.f32.partialorder %v180_v3, 0.7853982  ;;  %s3313_s13 = smov [#allocation8]  }
  0x5e   : > { %v2627_v11 = vadd.s32 4294967169, %v184_v7  ;;  %v394_v12 = vshrl.u32 %v393_v10, 23  ;;  %v397_v13 = vand.u32 8388607, %v390_v9  ;;  %v188_v16 = vor.u32 8388608, %v187_v8  ;;  %p3230_p6 = pnand %p3229_p4, %p3420_p12  ;;  %s3232_s5 = sshll.u32 %s3313_s13, 4  ;;  %s3233_s5 = int_to_ptr.vmem [resolvable:$false] %s3232_s5 }
  0x5f   : > { %v604_v19 = vshrl.u32 %v603_v14, 23  ;;  %s3234_s6 = scalar_lea.vmem %s3233_s5, 128  ;;  %p3235_p10 = scmp.lt.s32.totalorder %s4100_s22, %s3233_s5 }
  0x60   : > { %v190_v15 = vadd.s32 1, %v2627_v11  ;;  %v2635_v17 = vadd.s32 4294967169, %v394_v12  ;;  %v398_v18 = vor.u32 8388608, %v397_v13  ;;  %v3499_v25 = vshll.u32 %v188_v16, 8  ;;  %p3231_p8 = pneg %p3230_p6  ;;  %p3236_p13 = scmp.lt.s32.totalorder %s3234_s6, %s3228_s4 }
  0x61   : > { %v3503_v27 = vadd.s32 4294967169, %v604_v19 }
  0x62   : > { %vm191_vm0 = vcmp.gt.s32.totalorder %v190_v15, 0  ;;  %v400_v21 = vadd.s32 1, %v2635_v17  ;;  %v3501_v26 = vshll.u32 %v398_v18, 8  ;;  %p3237_p3 = por %p3236_p13, %p3235_p10 }
  0x63   : > { %v192_v20 = vsel %vm191_vm0, %v190_v15, 0 }
  0x64   : > { %v193_v22 = vshrl.u32 %v192_v20, 5  ;;  %v194_v23 = vand.u32 31, %v192_v20  ;;  %vm401_vm1 = vcmp.gt.s32.totalorder %v400_v21, 0  ;;  %p3238_p7 = pnand %p3237_p3, %p3231_p8 }
  0x65   : > { %v402_v49 = vsel %vm401_vm1, %v400_v21, 0 }
  0x66   : > { %v195_v28 = vsub.s32 32, %v194_v23  ;;  %v197_v30 = vshll.u32 %v3304_v29, %v194_v23  ;;  %v200_v32 = vshll.u32 %v3305_v31, %v194_v23  ;;  %v203_v34 = vshll.u32 %v3306_v33, %v194_v23 }
  0x67   : > { %v206_v36 = vshll.u32 %v3307_v35, %v194_v23  ;;  %v209_v38 = vshll.u32 %v3308_v37, %v194_v23  ;;  %vm212_vm2 = vcmp.lt.s32.totalorder %v193_v22, 1  ;;  %vm213_vm3 = vcmp.lt.s32.totalorder %v193_v22, 2 }
  0x68   : > { %v196_v39 = vshrl.u32 %v3304_v29, %v195_v28  ;;  %v198_v40 = vshrl.u32 %v3305_v31, %v195_v28  ;;  %v201_v41 = vshrl.u32 %v3306_v33, %v195_v28  ;;  %v204_v42 = vshrl.u32 %v3307_v35, %v195_v28 }
  0x69   : > { %v207_v43 = vshrl.u32 %v3308_v37, %v195_v28  ;;  %v210_v45 = vshrl.u32 %v3309_v44, %v195_v28  ;;  %vm214_vm4 = vcmp.lt.s32.totalorder %v193_v22, 3  ;;  %vm215_vm5 = vcmp.lt.s32.totalorder %v193_v22, 4 }
  0x6a   : > { %v199_v46 = vor.u32 %v198_v40, %v197_v30  ;;  %v202_v47 = vor.u32 %v201_v41, %v200_v32  ;;  %v205_v48 = vor.u32 %v204_v42, %v203_v34  ;;  %v403_v52 = vshrl.u32 %v402_v49, 5 }
  0x6b   : > { %v208_v50 = vor.u32 %v207_v43, %v206_v36  ;;  %v211_v51 = vor.u32 %v210_v45, %v209_v38  ;;  %v404_v53 = vand.u32 31, %v402_v49  ;;  %v610_v34 = vadd.s32 1, %v3503_v27 }
  0x6c   : > { %v216_v54 = vsel %vm212_vm2, %v196_v39, %v199_v46  ;;  %v217_v55 = vsel %vm215_vm5, %v205_v48, 2102212464  ;;  %v220_v56 = vsel %vm212_vm2, %v199_v46, %v202_v47  ;;  %v224_v57 = vsel %vm212_vm2, %v202_v47, %v205_v48 }
  0x6d   : > { %v218_v58 = vsel %vm214_vm4, %v202_v47, %v217_v55  ;;  %v221_v59 = vsel %vm215_vm5, %v208_v50, 920167782  ;;  %v225_v60 = vsel %vm215_vm5, %v211_v51, 1326507024  ;;  %v405_v61 = vsub.s32 32, %v404_v53 }
  0x6e   : > { %v219_v62 = vsel %vm213_vm3, %v216_v54, %v218_v58  ;;  %v222_v63 = vsel %vm214_vm4, %v205_v48, %v221_v59  ;;  %v226_v0 = vsel %vm214_vm4, %v208_v50, %v225_v60  ;;  %v407_v1 = vshll.u32 %v3304_v29, %v404_v53 }
  0x6f   : > { %v223_v4 = vsel %vm213_vm3, %v220_v56, %v222_v63  ;;  %v227_v7 = vsel %vm213_vm3, %v224_v57, %v226_v0  ;;  %v235_v8 = vmul.u32 %v3499_v25, %v219_v62  ;;  %v406_v10 = vshrl.u32 %v3304_v29, %v405_v61 }
  0x70   : > { %v3530_v11 = vmul.u32.u64.low %v3499_v25, %v227_v7  ;;  %v3531_v12 = vmul.u32.u64.high %v3499_v25, %v227_v7, %v3530_v11  ;;  %v3534_v13 = vmul.u32.u64.low %v3499_v25, %v223_v4  ;;  %v3535_v14 = vmul.u32.u64.high %v3499_v25, %v223_v4, %v3534_v13 }
  0x71   : > { %v408_v15 = vshrl.u32 %v3305_v31, %v405_v61  ;;  %v410_v16 = vshll.u32 %v3305_v31, %v404_v53  ;;  %v411_v17 = vshrl.u32 %v3306_v33, %v405_v61  ;;  %v413_v18 = vshll.u32 %v3306_v33, %v404_v53 }
  0x72   : > { %v414_v19 = vshrl.u32 %v3307_v35, %v405_v61  ;;  %v416_v20 = vshll.u32 %v3307_v35, %v404_v53  ;;  %v417_v21 = vshrl.u32 %v3308_v37, %v405_v61  ;;  %v419_v22 = vshll.u32 %v3308_v37, %v404_v53 }
  0x73   : > { %v409_v23 = vor.u32 %v408_v15, %v407_v1  ;;  %v412_v25 = vor.u32 %v411_v17, %v410_v16  ;;  %v420_v28 = vshrl.u32 %v3309_v44, %v405_v61  ;;  %vm422_vm6 = vcmp.lt.s32.totalorder %v403_v52, 1 }
  0x74   : > { %vm237_vm7 = vc.u32 %v3531_v12, %v3534_v13  ;;  %v238_v30 = vadd.s32 1, %v3535_v14  ;;  %v415_v32 = vor.u32 %v414_v19, %v413_v18  ;;  %v418_v36 = vor.u32 %v417_v21, %v416_v20 }
  0x75   : > { %v421_v38 = vor.u32 %v420_v28, %v419_v22  ;;  %vm423_vm8 = vcmp.lt.s32.totalorder %v403_v52, 2  ;;  %vm424_vm9 = vcmp.lt.s32.totalorder %v403_v52, 3  ;;  %vm425_vm10 = vcmp.lt.s32.totalorder %v403_v52, 4 }
  0x76   : > { %v239_v39 = vsel %vm237_vm7, %v238_v30, %v3535_v14  ;;  %v426_v40 = vsel %vm422_vm6, %v406_v10, %v409_v23  ;;  %v430_v41 = vsel %vm422_vm6, %v409_v23, %v412_v25  ;;  %v427_v43 = vsel %vm425_vm10, %v415_v32, 2102212464 }
  0x77   : > { %v240_v42 = vadd.s32 %v239_v39, %v235_v8  ;;  %v431_v45 = vsel %vm425_vm10, %v418_v36, 920167782  ;;  %v434_v46 = vsel %vm422_vm6, %v412_v25, %v415_v32  ;;  %v428_v47 = vsel %vm424_vm9, %v412_v25, %v427_v43 }
  0x78   : > { %v432_v48 = vsel %vm424_vm9, %v415_v32, %v431_v45  ;;  %v435_v49 = vsel %vm425_vm10, %v421_v38, 1326507024  ;;  %vm611_vm11 = vcmp.gt.s32.totalorder %v610_v34, 0  ;;  %v607_v53 = vand.u32 8388607, %v600_v24 }
  0x79   : > { %v241_v27 = vadd.s32 536870912, %v240_v42  ;;  %v433_v50 = vsel %vm423_vm8, %v430_v41, %v432_v48  ;;  %v436_v51 = vsel %vm424_vm9, %v418_v36, %v435_v49  ;;  %v429_v54 = vsel %vm423_vm8, %v426_v40, %v428_v47 }
  0x7a   : > { %v437_v55 = vsel %vm423_vm8, %v434_v46, %v436_v51  ;;  %v3561_v56 = vmul.u32.u64.low %v3501_v26, %v433_v50  ;;  %v3562_v57 = vmul.u32.u64.high %v3501_v26, %v433_v50, %v3561_v56  ;;  %v612_v61 = vsel %vm611_vm11, %v610_v34, 0 }
  0x7b   : > { %v242_v58 = vshrl.u32 %v241_v27, 30  ;;  %v3566_v59 = vmul.u32.u64.low %v3501_v26, %v437_v55  ;;  %v3567_v60 = vmul.u32.u64.high %v3501_v26, %v437_v55, %v3566_v59  ;;  %v614_v62 = vand.u32 31, %v612_v61 }
  0x7c   : > { %v445_v0 = vmul.u32 %v3501_v26, %v429_v54  ;;  %v448_v1 = vadd.s32 1, %v3562_v57  ;;  %v3572_v52 = vmul.f32 8.0, %v3480_v2  ;;  %v3310_v4 = vmov 0.0  }
  0x7d   : > { %v243_v63 = vshll.u32 %v242_v58, 30  ;;  %178 = vst [vmem:[#allocation2 + $0x1b] sm:$0x1f] %v3310_v4  ;;  %vm447_vm12 = vc.u32 %v3567_v60, %v3561_v56  ;;  %v608_v8 = vor.u32 8388608, %v607_v53  ;;  %v615_v11 = vsub.s32 32, %v614_v62 }
  0x7e   : > { %v449_v10 = vsel %vm447_vm12, %v448_v1, %v3562_v57  ;;  %v810_v26 = vand.u32 2147483647, %v3572_v52  ;;  %v813_v16 = vand.u32 2139095040, %v3572_v52  ;;  %v266_v19 = vsub.s32 4, %v242_v58 }
  0x7f   : > { %v244_v7 = vsub.s32 %v240_v42, %v243_v63  ;;  %v450_v15 = vadd.s32 %v449_v10, %v445_v0  ;;  %v617_v20 = vshll.u32 %v3304_v29, %v614_v62  ;;  %v3588_v21 = vshll.u32 %v608_v8, 8 }
  0x80   : > { %v618_v23 = vshrl.u32 %v3305_v31, %v615_v11  ;;  %v623_v25 = vshll.u32 %v3306_v33, %v614_v62  ;;  %v624_v28 = vshrl.u32 %v3307_v35, %v615_v11  ;;  %v3593_v32 = vshrl.u32 %v612_v61, 5 }
  0x81   : > { %v246_v14 = vsub.s32 0, %v244_v7  ;;  %v451_v22 = vadd.s32 536870912, %v450_v15  ;;  %v620_v3 = vshll.u32 %v3305_v31, %v614_v62  ;;  %v621_v34 = vshrl.u32 %v3306_v33, %v615_v11 }
  0x82   : > { %v236_v36 = vadd.s32 %v3534_v13, %v3531_v12  ;;  %v814_v39 = vshrl.u32 %v813_v16, 23  ;;  %v3603_v40 = vand.u32 8388607, %v810_v26  ;;  %v267_v42 = vsel %vm182_vm13, %v266_v19, %v242_v58 }
  0x83   : > { %v2628_v18 = vmin.u32 %v246_v14, %v244_v7  ;;  %v3599_v38 = vshrl.u32 %v451_v22, 30  ;;  %v626_v43 = vshll.u32 %v3307_v35, %v614_v62  ;;  %v627_v45 = vshrl.u32 %v3308_v37, %v615_v11 }
  0x84   : > { %v616_v47 = vshrl.u32 %v3304_v29, %v615_v11  ;;  %v619_v12 = vor.u32 %v618_v23, %v617_v20  ;;  %v625_v13 = vor.u32 %v624_v28, %v623_v25  ;;  %v622_v48 = vor.u32 %v621_v34, %v620_v3 }
  0x85   : > { %v248_v30 = vclz %v2628_v18  ;;  %v453_v46 = vshll.u32 %v3599_v38, 30  ;;  %v629_v49 = vshll.u32 %v3308_v37, %v614_v62  ;;  %vm635_vm0 = vcmp.lt.s32.totalorder %v3593_v32, 4 }
  0x86   : > { %v630_v51 = vshrl.u32 %v3309_v44, %v615_v11  ;;  %v637_v53 = vsel %vm635_vm0, %v625_v13, 2102212464  ;;  %v628_v58 = vor.u32 %v627_v45, %v626_v43  ;;  %v269_v59 = vsel %vm3583_vm14, 0, %v267_v42 }
  0x87   : > { %v2629_v41 = vadd.s32 4294967294, %v248_v30  ;;  %v3613_v50 = vsub.s32 %v450_v15, %v453_v46  ;;  %vm632_vm1 = vcmp.lt.s32.totalorder %v3593_v32, 1  ;;  %vm634_vm2 = vcmp.lt.s32.totalorder %v3593_v32, 3 }
  0x88   : > { %v636_v0 = vsel %vm632_vm1, %v616_v47, %v619_v12  ;;  %v638_v1 = vsel %vm634_vm2, %v622_v48, %v637_v53  ;;  %v631_v10 = vor.u32 %v630_v51, %v629_v49  ;;  %vm633_vm3 = vcmp.lt.s32.totalorder %v3593_v32, 2 }
  0x89   : > { %vm2630_vm15 = vcmp.lt.s32.totalorder %v2629_v41, 0  ;;  %v456_v61 = vsub.s32 0, %v3613_v50  ;;  %vm392_vm4 = vcmp.lt.s32.totalorder %v3486_v5, 0  ;;  %v640_v15 = vsel %vm632_vm1, %v619_v12, %v622_v48  ;;  %v3665_v12 = vld [vmem:[#allocation6] sm:$0xff]  }
  0x8a   : > { %v251_v27 = vsel %vm2630_vm15, 0, %v2629_v41  ;;  %v641_v16 = vsel %vm635_vm0, %v628_v58, 920167782  ;;  %v273_v18 = vadd.s32 3, %v269_v59  ;;  %v3636_v19 = vand.u32 3, %v269_v59 }
  0x8b   : > { %v252_v54 = vsub.s32 32, %v251_v27  ;;  %v253_v55 = vshll.u32 %v244_v7, %v251_v27  ;;  %v256_v57 = vsub.s32 4294967266, %v251_v27  ;;  %v446_v7 = vadd.s32 %v3561_v56, %v3567_v60 }
  0x8c   : > { %v2636_v8 = vmin.u32 %v456_v61, %v3613_v50  ;;  %v639_v56 = vsel %vm633_vm3, %v636_v0, %v638_v1  ;;  %v642_v23 = vsel %vm634_vm2, %v625_v13, %v641_v16  ;;  %v644_v25 = vsel %vm632_vm1, %v622_v48, %v625_v13 }
  0x8d   : > { %v254_v62 = vshrl.u32 %v236_v36, %v252_v54  ;;  %v257_v63 = vadd.s32 127, %v256_v57  ;;  %vm3646_vm5 = vcmp.le.f32.partialorder %v390_v9, 0.7853982  ;;  %v476_v3 = vsub.s32 4, %v3599_v38 }
  0x8e   : > { %v458_v20 = vclz %v2636_v8  ;;  %v643_v34 = vsel %vm633_vm3, %v640_v15, %v642_v23  ;;  %v645_v36 = vsel %vm635_vm0, %v631_v10, 1326507024  ;;  %v655_v46 = vmul.u32 %v3588_v21, %v639_v56 }
  0x8f   : > { %v255_v11 = vor.u32 %v254_v62, %v253_v55  ;;  %v258_v14 = vshll.u32 %v257_v63, 23  ;;  %v646_v42 = vsel %vm634_vm2, %v628_v58, %v645_v36  ;;  %v2651_v47 = vadd.s32 4294967169, %v814_v39 }
  0x90   : > { %v2637_v30 = vadd.s32 4294967294, %v458_v20  ;;  %v3658_v43 = vmul.u32.u64.low %v3588_v21, %v643_v34  ;;  %v3659_v45 = vmul.u32.u64.high %v3588_v21, %v643_v34, %v3658_v43  ;;  %v647_v9 = vsel %vm633_vm3, %v644_v25, %v646_v42 }
  0x91   : > { %v259_v60 = vor.u32 4788187, %v258_v14  ;;  %v262_v22 = vcvt.s32.f32 %v255_v11  ;;  %v3668_v49 = vmul.u32.u64.low %v3588_v21, %v647_v9  ;;  %v3669_v27 = vmul.u32.u64.high %v3588_v21, %v647_v9, %v3668_v49 }
  0x92   : > { %vm2638_vm6 = vcmp.lt.s32.totalorder %v2637_v30, 0  ;;  %v820_v55 = vadd.s32 1, %v2651_v47  ;;  %v658_v32 = vadd.s32 1, %v3659_v45  ;;  %vm1063_vm7 = vcmask 261120  }
  0x93   : > { %v260_v41 = vand.u32 2147483647, %v259_v60  ;;  %v461_v48 = vsel %vm2638_vm6, 0, %v2637_v30  ;;  %v477_v39 = vsel %vm392_vm4, %v476_v3, %v3599_v38  ;;  %v3678_v61 = vand.u32 3, %v273_v18  ;;  %2770 = vmatprep.mubr.msk.bf16.mxu0 %vm1063_vm7, %v3665_v12 }
  0x94   : > { %v462_v51 = vsub.s32 32, %v461_v48  ;;  %v463_v53 = vshll.u32 %v3613_v50, %v461_v48  ;;  %v466_v54 = vsub.s32 4294967266, %v461_v48  ;;  %vm821_vm8 = vcmp.gt.s32.totalorder %v820_v55, 0 }
  0x95   : > { %v263_v13 = vmul.f32 %v262_v22, %v260_v41  ;;  %vm657_vm9 = vc.u32 %v3669_v27, %v3658_v43  ;;  %v822_v50 = vsel %vm821_vm8, %v820_v55, 0  ;;  %v479_v1 = vsel %vm3646_vm5, 0, %v477_v39 }
  0x96   : > { %v464_v58 = vshrl.u32 %v446_v7, %v462_v51  ;;  %v467_v59 = vadd.s32 127, %v466_v54  ;;  %v659_v38 = vsel %vm657_vm9, %v658_v32, %v3659_v45  ;;  %v824_v8 = vand.u32 31, %v822_v50 }
  0x97   : > { %v264_v57 = vxor.u32 2147483648, %v263_v13  ;;  %v660_v7 = vadd.s32 %v659_v38, %v655_v46  ;;  %v3311_v16 = vmov 127   ;;  %vm380_vm10 = vcmp.eq.s32.totalorder %v3636_v19, 0 }
  0x98   : > { %v465_v63 = vor.u32 %v464_v58, %v463_v53  ;;  %v468_v0 = vshll.u32 %v467_v59, 23  ;;  %v825_v15 = vsub.s32 32, %v824_v8  ;;  %2958 = vset.pattern.permute.xlu0 %v3311_v16  ;;  %2969 = vset.pattern.permute.xlu1 %v3311_v16  ;;  %vm383_vm11 = vcmp.eq.s32.totalorder %v3636_v19, 2 }
  0x99   : > { %v265_v21 = vsel %vm182_vm13, %v264_v57, %v263_v13  ;;  %v661_v14 = vadd.s32 536870912, %v660_v7  ;;  %v818_v18 = vor.u32 8388608, %v3603_v40  ;;  %vm275_vm12 = vcmp.lt.s32.totalorder %v3678_v61, 2 }
  0x9a   : > { %v268_v62 = vsel %vm3583_vm14, %v3480_v2, %v265_v21  ;;  %v469_v10 = vor.u32 4788187, %v468_v0  ;;  %v472_v11 = vcvt.s32.f32 %v465_v63  ;;  %vm276_vm13 = vcmp.eq.s32.totalorder %v3678_v61, 0 }
  0x9b   : > { %3094 = vcosq.f32 %v268_v62  ;;  %vm279_vm14 = vcmp.eq.s32.totalorder %v3678_v61, 2  ;;  %vm379_vm15 = vcmp.lt.s32.totalorder %v3636_v19, 2  ;;  %v483_v20 = vadd.s32 3, %v479_v1 }
  0x9c   : > { %3096 = vsinq.f32 %v268_v62  ;;  %v470_v17 = vand.u32 2147483647, %v469_v10  ;;  %v3697_v56 = vshrl.u32 %v661_v14, 30  ;;  %vm272_vm0 = vweird.f32 %v3480_v2 }
  0x9d   : > { %v3700_v22 = vand.u32 3, %v479_v1  ;;  %v827_v23 = vshll.u32 %v3304_v29, %v824_v8  ;;  %v830_v40 = vshll.u32 %v3305_v31, %v824_v8  ;;  %v828_v30 = vshrl.u32 %v3305_v31, %v825_v15 }
  0x9e   : > { %v473_v60 = vmul.f32 %v472_v11, %v470_v17  ;;  %v663_v25 = vshll.u32 %v3697_v56, 30  ;;  %v831_v3 = vshrl.u32 %v3306_v33, %v825_v15  ;;  %v833_v34 = vshll.u32 %v3306_v33, %v824_v8 }
  0x9f   : > { %v834_v41 = vshrl.u32 %v3307_v35, %v825_v15  ;;  %v836_v42 = vshll.u32 %v3307_v35, %v824_v8  ;;  %v837_v45 = vshrl.u32 %v3308_v37, %v825_v15  ;;  %v3711_v9 = vand.u32 3, %v483_v20 }
  0xa0   : > { %v474_v36 = vxor.u32 2147483648, %v473_v60  ;;  %v3713_v46 = vsub.s32 %v660_v7, %v663_v25  ;;  %v839_v47 = vshll.u32 %v3308_v37, %v824_v8  ;;  %v840_v13 = vshrl.u32 %v3309_v44, %v825_v15 }
  0xa1   : > { %v823_v49 = vshrl.u32 %v822_v50, 5  ;;  %v826_v51 = vshrl.u32 %v3304_v29, %v825_v15  ;;  %v3720_v53 = vshll.u32 %v818_v18, 8  ;;  %v829_v32 = vor.u32 %v828_v30, %v827_v23 }
  0xa2   : > { %v475_v48 = vsel %vm392_vm4, %v474_v36, %v473_v60  ;;  %v666_v57 = vsub.s32 0, %v3713_v46  ;;  %v832_v58 = vor.u32 %v831_v3, %v830_v40  ;;  %v835_v21 = vor.u32 %v834_v41, %v833_v34 }
  0xa3   : > { %v478_v55 = vsel %vm3646_vm5, %v3486_v5, %v475_v48  ;;  %v838_v62 = vor.u32 %v837_v45, %v836_v42  ;;  %v841_v0 = vor.u32 %v840_v13, %v839_v47  ;;  %vm489_vm1 = vcmp.eq.s32.totalorder %v3711_v9, 2 }
  0xa4   : > { %3098 = vcosq.f32 %v478_v55  ;;  %v2644_v50 = vmin.u32 %v666_v57, %v3713_v46  ;;  %vm593_vm2 = vcmp.eq.s32.totalorder %v3700_v22, 2  ;;  %vm842_vm3 = vcmp.lt.s32.totalorder %v823_v49, 1 }
  0xa5   : > { %v3095_v54 = vpop.eup %3094  ;;  %3100 = vsinq.f32 %v478_v55  ;;  %vm845_vm4 = vcmp.lt.s32.totalorder %v823_v49, 4  ;;  %vm486_vm5 = vcmp.eq.s32.totalorder %v3711_v9, 0  ;;  %vm590_vm6 = vcmp.eq.s32.totalorder %v3700_v22, 0 }
  0xa6   : > { %v3097_v59 = vpop.eup %3096  ;;  %v280_v39 = vxor.u32 2147483648, %v3095_v54  ;;  %v668_v8 = vclz %v2644_v50  ;;  %v847_v10 = vsel %vm845_vm4, %v835_v21, 2102212464  ;;  %vm485_vm8 = vcmp.lt.s32.totalorder %v3711_v9, 2 }
  0xa7   : > { %v277_v63 = vxor.u32 2147483648, %v3097_v59  ;;  %vm589_vm9 = vcmp.lt.s32.totalorder %v3700_v22, 2  ;;  %v846_v61 = vsel %vm842_vm3, %v826_v51, %v829_v32  ;;  %v850_v18 = vsel %vm842_vm3, %v829_v32, %v832_v58 }
  0xa8   : > { %v281_v38 = vsel %vm279_vm14, %v280_v39, %v3097_v59  ;;  %v385_v28 = vsel %vm383_vm11, %v280_v39, %v3097_v59  ;;  %vm843_vm11 = vcmp.lt.s32.totalorder %v823_v49, 2  ;;  %v2645_v17 = vadd.s32 4294967294, %v668_v8  ;;  %v3795_v8 = vld [vmem:[#allocation6 + $0x20] sm:$0xff]  }
  0xa9   : > { %v278_v1 = vsel %vm276_vm13, %v3095_v54, %v277_v63  ;;  %v382_v7 = vsel %vm380_vm10, %v3095_v54, %v277_v63  ;;  %vm844_vm13 = vcmp.lt.s32.totalorder %v823_v49, 3  ;;  %vm482_vm10 = vweird.f32 %v3486_v5  ;;  %v3806_v5 = vld [vmem:[#allocation6 + $0x30] sm:$0xff]  }
  0xaa   : > { %v282_v11 = vsel %vm275_vm12, %v278_v1, %v281_v38  ;;  %v386_v14 = vsel %vm379_vm15, %v382_v7, %v385_v28  ;;  %v848_v19 = vsel %vm844_vm13, %v832_v58, %v847_v10  ;;  %v851_v20 = vsel %vm845_vm4, %v838_v62, 920167782 }
  0xab   : > { %v283_v15 = vsel %vm272_vm0, nan, %v282_v11  ;;  %v387_v16 = vsel %vm272_vm0, nan, %v386_v14  ;;  %v854_v60 = vsel %vm842_vm3, %v832_v58, %v835_v21  ;;  %v656_v23 = vadd.s32 %v3658_v43, %v3669_v27 }
  0xac   : > { %284 = vst [vmem:[#allocation2 + $0x3] sm:$0x7] %v283_v15  ;;  %388 = vst [vmem:[#allocation2 + $0xf] sm:$0x7] %v387_v16  ;;  %vm2646_vm12 = vcmp.lt.s32.totalorder %v2645_v17, 0  ;;  %v852_v2 = vsel %vm844_vm13, %v835_v21, %v851_v20  ;;  %v849_v30 = vsel %vm843_vm11, %v846_v61, %v848_v19  ;;  %v1029_v58 = vunpack.c.l.bf16 %v3665_v12 }
  0xad   : > { %v855_v40 = vsel %vm845_vm4, %v841_v0, 1326507024  ;;  %v671_v25 = vsel %vm2646_vm12, 0, %v2645_v17  ;;  %v853_v3 = vsel %vm843_vm11, %v850_v18, %v852_v2  ;;  %v865_v32 = vmul.u32 %v3720_v53, %v849_v30 }
  0xae   : > { %v856_v34 = vsel %vm844_vm13, %v838_v62, %v855_v40  ;;  %v672_v36 = vsub.s32 32, %v671_v25  ;;  %v673_v41 = vshll.u32 %v3713_v46, %v671_v25  ;;  %v676_v42 = vsub.s32 4294967266, %v671_v25  ;;  %v3099_v47 = vpop.eup %3098  ;;  %v3775_v46 = vld [vmem:[#allocation6 + $0x8] sm:$0xff]  }
  0xaf   : > { %v857_v45 = vsel %vm843_vm11, %v854_v60, %v856_v34  ;;  %v3770_v13 = vmul.u32.u64.low %v3720_v53, %v853_v3  ;;  %v3771_v48 = vmul.u32.u64.high %v3720_v53, %v853_v3, %v3770_v13  ;;  %v3101_v51 = vpop.eup %3100  ;;  %v490_v54 = vxor.u32 2147483648, %v3099_v47 }
  0xb0   : > { %v3766_v43 = vmul.u32.u64.low %v3720_v53, %v857_v45  ;;  %v3767_v27 = vmul.u32.u64.high %v3720_v53, %v857_v45, %v3766_v43  ;;  %v674_v55 = vshrl.u32 %v656_v23, %v672_v36  ;;  %v677_v57 = vadd.s32 127, %v676_v42  ;;  %v3816_v36 = vld [vmem:[#allocation6 + $0x40] sm:$0xff]  }
  0xb1   : > { %v487_v49 = vxor.u32 2147483648, %v3101_v51  ;;  %v1030_v59 = vunpack.c.h.bf16 %v3665_v12  ;;  %v1031_v39 = vunpack.c.l.bf16 %v3775_v46  ;;  %v491_v21 = vsel %vm489_vm1, %v490_v54, %v3101_v51 }
  0xb2   : > { %v595_v62 = vsel %vm593_vm2, %v490_v54, %v3101_v51  ;;  %v675_v63 = vor.u32 %v674_v55, %v673_v41  ;;  %v678_v50 = vshll.u32 %v677_v57, 23  ;;  %vm867_vm14 = vc.u32 %v3767_v27, %v3770_v13  ;;  %v3822_v51 = vld [vmem:[#allocation6 + $0x50] sm:$0xff]  }
  0xb3   : > { %v488_v53 = vsel %vm486_vm5, %v3099_v47, %v487_v49  ;;  %v592_v0 = vsel %vm590_vm6, %v3099_v47, %v487_v49  ;;  %v1032_v12 = vunpack.c.h.bf16 %v3775_v46  ;;  %v868_v14 = vadd.s32 1, %v3771_v48 }
  0xb4   : > { %v492_v38 = vsel %vm485_vm8, %v488_v53, %v491_v21  ;;  %v596_v28 = vsel %vm589_vm9, %v592_v0, %v595_v62  ;;  %v679_v1 = vor.u32 4788187, %v678_v50  ;;  %v682_v7 = vcvt.s32.f32 %v675_v63  ;;  %v1732_v53 = vld [vmem:[#allocation6 + $0x70] sm:$0xff]  }
  0xb5   : > { %v493_v10 = vsel %vm482_vm10, nan, %v492_v38  ;;  %v597_v11 = vsel %vm482_vm10, nan, %v596_v28  ;;  %v2959_v15 = vpack.i.bf16 %v1030_v59, %v1029_v58  ;;  %v686_v9 = vsub.s32 4, %v3697_v56 }
  0xb6   : > { %494 = vst [vmem:[#allocation2 + $0x6] sm:$0x7] %v493_v10  ;;  %v680_v16 = vand.u32 2147483647, %v679_v1  ;;  %598 = vst [vmem:[#allocation2 + $0x12] sm:$0x7] %v597_v11  ;;  %v869_v22 = vsel %vm867_vm14, %v868_v14, %v3771_v48  ;;  %v2964_v17 = vpack.i.bf16 %v1032_v12, %v1031_v39  ;;  %v1228_v61 = vunpack.c.l.bf16 %v3795_v8 }
  0xb7   : > { %2960 = vperm.xlu0 %2958, %v2959_v15   ;;  %v1229_v19 = vunpack.c.h.bf16 %v3795_v8  ;;  %v870_v20 = vadd.s32 %v869_v22, %v865_v32  ;;  %vm602_vm15 = vcmp.lt.s32.totalorder %v3489_v6, 0  ;;  %vm601_vm0 = vcmp.le.f32.partialorder %v600_v24, 0.7853982  ;;  %v1633_v39 = vld [vmem:[#allocation6 + $0x60] sm:$0xff]  }
  0xb8   : > { %v683_v18 = vmul.f32 %v682_v7, %v680_v16  ;;  %v687_v23 = vsel %vm602_vm15, %v686_v9, %v3697_v56  ;;  %v1327_v25 = vunpack.c.l.bf16 %v3806_v5  ;;  %v1328_v30 = vunpack.c.h.bf16 %v3806_v5 }
  0xb9   : > { %v871_v2 = vadd.s32 536870912, %v870_v20  ;;  %v2980_v40 = vpack.i.bf16 %v1229_v19, %v1228_v61  ;;  %v689_v42 = vsel %vm601_vm0, 0, %v687_v23  ;;  %v1426_v45 = vunpack.c.l.bf16 %v3816_v36 }
  0xba   : > { %v684_v60 = vxor.u32 2147483648, %v683_v18  ;;  %v2990_v56 = vpack.i.bf16 %v1328_v30, %v1327_v25  ;;  %v1427_v47 = vunpack.c.h.bf16 %v3816_v36  ;;  %v693_v43 = vadd.s32 3, %v689_v42 }
  0xbb   : > { %2965 = vperm.xlu0 %2958, %v2964_v17   ;;  %v3814_v34 = vshrl.u32 %v871_v2, 30  ;;  %v798_v55 = vand.u32 3, %v689_v42  ;;  %v1539_v32 = vunpack.c.l.bf16 %v3822_v51  ;;  %v1540_v49 = vunpack.c.h.bf16 %v3822_v51 }
  0xbc   : > { %v685_v3 = vsel %vm602_vm15, %v684_v60, %v683_v18  ;;  %v3000_v57 = vpack.i.bf16 %v1427_v47, %v1426_v45  ;;  %v694_v58 = vand.u32 3, %v693_v43  ;;  %vm692_vm1 = vweird.f32 %v3489_v6  ;;  %v1831_v18 = vld [vmem:[#allocation6 + $0x80] sm:$0xff]  }
  0xbd   : > { %v688_v41 = vsel %vm601_vm0, %v3489_v6, %v685_v3  ;;  %v873_v24 = vshll.u32 %v3814_v34, 30  ;;  %vm799_vm2 = vcmp.lt.s32.totalorder %v798_v55, 2  ;;  %v3010_v62 = vpack.i.bf16 %v1540_v49, %v1539_v32  ;;  %v2445_v32 = vld [vmem:[#allocation6 + $0xa0] sm:$0x3] }
  0xbe   : > { %3102 = vcosq.f32 %v688_v41  ;;  %v1639_v63 = vunpack.c.l.bf16 %v1633_v39  ;;  %v1640_v50 = vunpack.c.h.bf16 %v1633_v39  ;;  %vm699_vm3 = vcmp.eq.s32.totalorder %v694_v58, 2 }
  0xbf   : > { %3104 = vsinq.f32 %v688_v41  ;;  %2981 = vperm.xlu0 %2958, %v2980_v40   ;;  %v874_v48 = vsub.s32 %v870_v20, %v873_v24  ;;  %vm800_vm4 = vcmp.eq.s32.totalorder %v798_v55, 0  ;;  %vm803_vm5 = vcmp.eq.s32.totalorder %v798_v55, 2  ;;  %v2376_v41 = vld [vmem:[#allocation6 + $0x98] sm:$0xff]  }
  0xc0   : > { %vm695_vm6 = vcmp.lt.s32.totalorder %v694_v58, 2  ;;  %vm696_vm8 = vcmp.eq.s32.totalorder %v694_v58, 0  ;;  %v866_v1 = vadd.s32 %v3770_v13, %v3767_v27  ;;  %v1738_v10 = vunpack.c.l.bf16 %v1732_v53 }
  0xc1   : > { %v876_v54 = vsub.s32 0, %v874_v48  ;;  %v1739_v11 = vunpack.c.h.bf16 %v1732_v53  ;;  %v3020_v9 = vpack.i.bf16 %v1640_v50, %v1639_v63  ;;  %v1838_v30 = vunpack.c.l.bf16 %v1831_v18 }
  0xc2   : > { %v1839_v3 = vunpack.c.h.bf16 %v1831_v18  ;;  %v896_v6 = vsub.s32 4, %v3814_v34  ;;  %vm812_vm11 = vcmp.lt.s32.totalorder %v3572_v52, 0  ;;  %vm811_vm13 = vcmp.le.f32.partialorder %v810_v26, 0.7853982  ;;  %v3854_v18 = vld [vmem:[#allocation6 + $0x18] sm:$0xff]  }
  0xc3   : > { %2991 = vperm.xlu0 %2958, %v2990_v56   ;;  %v2652_v59 = vmin.u32 %v876_v54, %v874_v48  ;;  %v3030_v25 = vpack.i.bf16 %v1739_v11, %v1738_v10  ;;  %v2381_v56 = vunpack.c.l.bf16 %v2376_v41  ;;  %v2447_v39 = vunpack.c.l.bf16 %v2445_v32 }
  0xc4   : > { %v3040_v43 = vpack.i.bf16 %v1839_v3, %v1838_v30  ;;  %v897_v58 = vsel %vm812_vm11, %v896_v6, %v3814_v34  ;;  %v3862_v30 = vld [vmem:[#allocation6 + $0x38] sm:$0xff]  }
  0xc5   : > { %v878_v21 = vclz %v2652_v59 }
  0xc7   : > { %3001 = vperm.xlu0 %2958, %v3000_v57   ;;  %v2653_v12 = vadd.s32 4294967294, %v878_v21 }
  0xc8   : > { %v3103_v0 = vpop.eup %3102 }
  0xc9   : > { %v3105_v38 = vpop.eup %3104  ;;  %v700_v28 = vxor.u32 2147483648, %v3103_v0  ;;  %vm2654_vm9 = vcmp.lt.s32.totalorder %v2653_v12, 0 }
  0xca   : > { %v697_v7 = vxor.u32 2147483648, %v3105_v38  ;;  %v881_v16 = vsel %vm2654_vm9, 0, %v2653_v12 }
  0xcb   : > { %v701_v14 = vsel %vm699_vm3, %v700_v28, %v3105_v38  ;;  %v805_v15 = vsel %vm803_vm5, %v700_v28, %v3105_v38  ;;  %3011 = vperm.xlu0 %2958, %v3010_v62   ;;  %v882_v61 = vsub.s32 32, %v881_v16  ;;  %v883_v19 = vshll.u32 %v874_v48, %v881_v16 }
  0xcc   : > { %v698_v22 = vsel %vm696_vm8, %v3103_v0, %v697_v7  ;;  %v802_v17 = vsel %vm800_vm4, %v3103_v0, %v697_v7  ;;  %v886_v27 = vsub.s32 4294967266, %v881_v16  ;;  %v2382_v48 = vunpack.c.h.bf16 %v2376_v41  ;;  %v1019_v16 = vld [vmem:[#allocation2] sm:$0xff] }
  0xcd   : > { %v702_v20 = vsel %vm695_vm6, %v698_v22, %v701_v14  ;;  %v806_v60 = vsel %vm799_vm2, %v802_v17, %v805_v15  ;;  %v884_v2 = vshrl.u32 %v866_v1, %v882_v61  ;;  %v899_v62 = vsel %vm811_vm13, 0, %v897_v58  ;;  %v3878_v58 = vld [vmem:[#allocation6 + $0x78] sm:$0xff]  }
  0xce   : > { %v703_v13 = vsel %vm692_vm1, nan, %v702_v20  ;;  %v807_v23 = vsel %vm692_vm1, nan, %v806_v60  ;;  %v887_v40 = vadd.s32 127, %v886_v27  ;;  %v3050_v57 = vpack.i.bf16 %v2382_v48, %v2381_v56 }
  0xcf   : > { %704 = vst [vmem:[#allocation2 + $0x9] sm:$0x7] %v703_v13  ;;  %808 = vst [vmem:[#allocation2 + $0x15] sm:$0x7] %v807_v23  ;;  %3021 = vperm.xlu0 %2958, %v3020_v9   ;;  %v885_v42 = vor.u32 %v884_v2, %v883_v19  ;;  %v903_v63 = vadd.s32 3, %v899_v62  ;;  %v1008_v53 = vand.u32 3, %v899_v62  ;;  %vm902_vm2 = vweird.f32 %v3572_v52 }
  0xd0   : > { %v888_v24 = vshll.u32 %v887_v40, 23  ;;  %v1131_v27 = vunpack.c.l.bf16 %v3854_v18  ;;  %v1132_v13 = vunpack.c.h.bf16 %v3854_v18  ;;  %v3858_v23 = vld [vmem:[#allocation6 + $0x28] sm:$0xff]   ;;  %v1329_v41 = vunpack.c.l.bf16 %v3862_v30 }
  0xd1   : > { %v892_v47 = vcvt.s32.f32 %v885_v42  ;;  %v904_v50 = vand.u32 3, %v903_v63  ;;  %vm1013_vm12 = vcmp.eq.s32.totalorder %v1008_v53, 2  ;;  %vm1010_vm15 = vcmp.eq.s32.totalorder %v1008_v53, 0  ;;  %v3882_v62 = vld [vmem:[#allocation6 + $0x88] sm:$0xff]  }
  0xd2   : > { %v889_v45 = vor.u32 4788187, %v888_v24  ;;  %vm1009_vm1 = vcmp.lt.s32.totalorder %v1008_v53, 2  ;;  %v2975_v40 = vpack.i.bf16 %v1132_v13, %v1131_v27  ;;  %v1330_v42 = vunpack.c.h.bf16 %v3862_v30  ;;  %v3866_v24 = vld [vmem:[#allocation6 + $0x48] sm:$0xff]  }
  0xd3   : > { %3031 = vperm.xlu0 %2958, %v3030_v25   ;;  %vm909_vm10 = vcmp.eq.s32.totalorder %v904_v50, 2  ;;  %vm906_vm14 = vcmp.eq.s32.totalorder %v904_v50, 0  ;;  %vm905_vm0 = vcmp.lt.s32.totalorder %v904_v50, 2  ;;  %v1230_v25 = vunpack.c.l.bf16 %v3858_v23 }
  0xd4   : > { %v890_v54 = vand.u32 2147483647, %v889_v45  ;;  %v2995_v56 = vpack.i.bf16 %v1330_v42, %v1329_v41  ;;  %v1428_v45 = vunpack.c.l.bf16 %v3866_v24  ;;  %v1840_v50 = vunpack.c.l.bf16 %v3882_v62 }
  0xd5   : > { %v1841_v53 = vunpack.c.h.bf16 %v3882_v62 }
  0xd6   : > { %v893_v55 = vmul.f32 %v892_v47, %v890_v54  ;;  %v1021_v9 = vld [vmem:[#allocation2 + $0x10] sm:$0xff]  ;;  %v1429_v47 = vunpack.c.h.bf16 %v3866_v24 }
  0xd7   : > { %3041 = vperm.xlu0 %2958, %v3040_v43   ;;  %v3870_v43 = vld [vmem:[#allocation6 + $0x58] sm:$0xff]  }
  0xd8   : > { %v894_v49 = vxor.u32 2147483648, %v893_v55  ;;  %v3005_v48 = vpack.i.bf16 %v1429_v47, %v1428_v45  ;;  %v1541_v54 = vunpack.c.l.bf16 %v3870_v43  ;;  %v1542_v6 = vunpack.c.h.bf16 %v3870_v43 }
  0xda   : > { %v895_v59 = vsel %vm812_vm11, %v894_v49, %v893_v55  ;;  %v3874_v55 = vld [vmem:[#allocation6 + $0x68] sm:$0xff]  }
  0xdb   : > { %3051 = vperm.xlu0 %2958, %v3050_v57   ;;  %v898_v21 = vsel %vm811_vm13, %v3572_v52, %v895_v59  ;;  %v1123_v52 = vld [vmem:[#allocation6 + $0x10] sm:$0xff]   ;;  %v3015_v57 = vpack.i.bf16 %v1542_v6, %v1541_v54  ;;  %v1641_v32 = vunpack.c.l.bf16 %v3874_v55  ;;  %v1642_v49 = vunpack.c.h.bf16 %v3874_v55 }
  0xdc   : > { %3106 = vcosq.f32 %v898_v21  ;;  %2778 = vmatprep.mubr.msk.bf16.mxu1 %vm1063_vm7, %v1123_v52  ;;  %v1129_v20 = vunpack.c.l.bf16 %v1123_v52  ;;  %v1130_v60 = vunpack.c.h.bf16 %v1123_v52 }
  0xdd   : > { %3108 = vsinq.f32 %v898_v21  ;;  %v3025_v59 = vpack.i.bf16 %v1642_v49, %v1641_v32  ;;  %v1741_v21 = vunpack.c.h.bf16 %v3878_v58 }
  0xde   : > { %v2970_v2 = vpack.i.bf16 %v1130_v60, %v1129_v20 }
  0xdf   : > { %2450 = vperm.xlu0 %2958, %v2447_v39   ;;  %v1740_v39 = vunpack.c.l.bf16 %v3878_v58 }
  0xe0   : > { %2971 = vperm.xlu1 %2969, %v2970_v2  }
  0xe1   : > { %v3035_v63 = vpack.i.bf16 %v1741_v21, %v1740_v39 }
  0xe4   : > { %2976 = vperm.xlu1 %2969, %v2975_v40  }
  0xe6   : > { %v3107_v0 = vpop.eup %3106 }
  0xe7   : > { %v3109_v12 = vpop.eup %3108  ;;  %v910_v26 = vxor.u32 2147483648, %v3107_v0 }
  0xe8   : > { %v907_v34 = vxor.u32 2147483648, %v3109_v12 }
  0xe9   : > { %v911_v38 = vsel %vm909_vm10, %v910_v26, %v3109_v12  ;;  %v1015_v28 = vsel %vm1013_vm12, %v910_v26, %v3109_v12  ;;  %v3886_v12 = vld [vmem:[#allocation6 + $0x90] sm:$0x1] }
  0xea   : > { %v908_v1 = vsel %vm906_vm14, %v3107_v0, %v907_v34  ;;  %v1012_v7 = vsel %vm1010_vm15, %v3107_v0, %v907_v34  ;;  %v3045_v0 = vpack.i.bf16 %v1841_v53, %v1840_v50  ;;  %v1842_v26 = vunpack.c.l.bf16 %v3886_v12 }
  0xeb   : > { %v912_v10 = vsel %vm905_vm0, %v908_v1, %v911_v38  ;;  %v1016_v11 = vsel %vm1009_vm1, %v1012_v7, %v1015_v28  ;;  %vm1573_vm14 = vcmask 523264  }
  0xec   : > { %v913_v14 = vsel %vm902_vm2, nan, %v912_v10  ;;  %v1017_v15 = vsel %vm902_vm2, nan, %v1016_v11 }
  0xed   : > { %914 = vst [vmem:[#allocation2 + $0xc] sm:$0x7] %v913_v14  ;;  %1018 = vst [vmem:[#allocation2 + $0x18] sm:$0x7] %v1017_v15 }
  0xf4   : > { %v1020_v22 = vld [vmem:[#allocation2 + $0x8] sm:$0xff]  ;;  %v1022_v17 = vld [vmem:[#allocation2 + $0x18] sm:$0xff] }
  0xf5   : > { %v3843_v61 = vpack.c.bf16 %v1020_v22, %v1019_v16  ;;  %v3845_v19 = vpack.c.bf16 %v1022_v17, %v1021_v9 }
  0xf7   : > { %2766 = vmatprep.subr.bf16.mxu0 %v3843_v61 }
  0xf8   : > { %2767 = vmatpush3.bf16.msra.mxu0 %v3843_v61 }
  0xf9   : > { %2768 = vmatprep.subr.bf16.mxu0 %v3845_v19 }
  0xfc   : > { %2769 = vmatpush3.bf16.msra.mxu0 %v3845_v19 }
  0xff   : > { %2771 = vmatmul.mubr.msk.bf16.vlgmr.msra.gmra.mrb[0].mxu0 %vm1063_vm7, %v3775_v46  ;;  %v1231_v46 = vunpack.c.h.bf16 %v3858_v23 }
 0x100   : > { %2786 = vmatprep.mubr.msk.bf16.mxu0 %vm1063_vm7, %v3795_v8 }
 0x101   : > { %v2985_v3 = vpack.i.bf16 %v1231_v46, %v1230_v25 }
 0x103   : > { %2986 = vperm.xlu1 %2969, %v2985_v3  }
 0x107   : > { %2996 = vperm.xlu1 %2969, %v2995_v56  }
 0x10b   : > { %3006 = vperm.xlu1 %2969, %v3005_v48  }
 0x10f   : > { %3016 = vperm.xlu1 %2969, %v3015_v57  }
 0x113   : > { %3026 = vperm.xlu1 %2969, %v3025_v59  }
 0x117   : > { %3036 = vperm.xlu1 %2969, %v3035_v63  }
 0x11b   : > { %3046 = vperm.xlu1 %2969, %v3045_v0  }
 0x11f   : > { %1865 = vperm.xlu1 %2969, %v1842_v26  }
 0x136   : > { %v2961_v34 = vpop.permute.xlu0 %2960 }
 0x13a   : > { %v2966_v38 = vpop.permute.xlu0 %2965 }
 0x15f   : > { %v2972_v27 = vpop.permute.xlu1 %2971 }
 0x163   : > { %v2977_v13 = vpop.permute.xlu1 %2976 }
 0x182   : > { %v2987_v8 = vpop.permute.xlu1 %2986 }
 0x1d2   : > { %v2772_v28 = vpop.f32.mrb[0].mxu0 }
 0x1d3   : > { %v3132_v1 = vadd.low.f32.bf16 %v2772_v28, %v2966_v38  ;;  %v1104_v7 = vpop.f32.mrb[1].mxu0 }
 0x1d4   : > { %v3133_v10 = vadd.low.f32.bf16 %v1104_v7, %v2961_v34  ;;  %v2773_v11 = vpop.f32.mrb[2].mxu0 }
 0x1d5   : > { %v3134_v14 = vadd.high.f32.bf16 %v2773_v11, %v2966_v38  ;;  %v1107_v15 = vpop.f32.mrb[3].mxu0  ;;  %v1121_v9 = vmax.f32 %v3132_v1, 0.0 }
 0x1d6   : > { %v3135_v16 = vadd.high.f32.bf16 %v1107_v15, %v2961_v34  ;;  %v1119_v17 = vmax.f32 %v3133_v10, 0.0 }
 0x1d7   : > { %v1122_v22 = vmax.f32 %v3134_v14, 0.0 }
 0x1d8   : > { %v1120_v52 = vmax.f32 %v3135_v16, 0.0 }
 0x1d9   : > { %v1128_v20 = vpack.c.bf16 %v1122_v22, %v1121_v9 }
 0x1da   : > { %v1127_v60 = vpack.c.bf16 %v1120_v52, %v1119_v17 }
 0x1dc   : > { %2774 = vmatprep.subr.bf16.mxu1 %v1127_v60 }
 0x1dd   : > { %2775 = vmatpush3.bf16.msra.mxu1 %v1127_v60 }
 0x1de   : > { %2776 = vmatprep.subr.bf16.mxu1 %v1128_v20 }
 0x1e1   : > { %2777 = vmatpush3.bf16.msra.mxu1 %v1128_v20 }
 0x1e4   : > { %2779 = vmatmul.mubr.msk.bf16.vlgmr.msra.gmra.mrb[0].mxu1 %vm1063_vm7, %v3854_v18  ;;  %v2982_v18 = vpop.permute.xlu0 %2981 }
 0x1e5   : > { %2794 = vmatprep.mubr.msk.bf16.mxu1 %vm1063_vm7, %v3806_v5  ;;  %v2997_v5 = vpop.permute.xlu1 %2996 }
 0x2b7   : > { %v2780_v2 = vpop.f32.mrb[0].mxu1 }
 0x2b8   : > { %v3136_v40 = vadd.low.f32.bf16 %v2780_v2, %v2977_v13  ;;  %v1203_v25 = vpop.f32.mrb[1].mxu1 }
 0x2b9   : > { %v3137_v46 = vadd.low.f32.bf16 %v1203_v25, %v2972_v27  ;;  %v2781_v3 = vpop.f32.mrb[2].mxu1 }
 0x2ba   : > { %v3138_v41 = vadd.high.f32.bf16 %v2781_v3, %v2977_v13  ;;  %v1206_v42 = vpop.f32.mrb[3].mxu1  ;;  %v1220_v45 = vmax.f32 %v3136_v40, 0.0 }
 0x2bb   : > { %v3139_v56 = vadd.high.f32.bf16 %v1206_v42, %v2972_v27  ;;  %v1218_v48 = vmax.f32 %v3137_v46, 0.0 }
 0x2bc   : > { %v1221_v47 = vmax.f32 %v3138_v41, 0.0 }
 0x2bd   : > { %v1219_v54 = vmax.f32 %v3139_v56, 0.0 }
 0x2be   : > { %v1227_v6 = vpack.c.bf16 %v1221_v47, %v1220_v45 }
 0x2bf   : > { %v1226_v57 = vpack.c.bf16 %v1219_v54, %v1218_v48 }
 0x2c1   : > { %2782 = vmatprep.subr.bf16.mxu0 %v1226_v57 }
 0x2c2   : > { %2783 = vmatpush3.bf16.msra.mxu0 %v1226_v57 }
 0x2c3   : > { %2784 = vmatprep.subr.bf16.mxu0 %v1227_v6 }
 0x2c6   : > { %2785 = vmatpush3.bf16.msra.mxu0 %v1227_v6 }
 0x2c9   : > { %2787 = vmatmul.mubr.msk.bf16.vlgmr.msra.gmra.mrb[4].mxu0 %vm1063_vm7, %v3858_v23  ;;  %v2992_v23 = vpop.permute.xlu0 %2991 }
 0x2ca   : > { %2802 = vmatprep.mubr.msk.bf16.mxu0 %vm1063_vm7, %v3816_v36  ;;  %v3908_v36 = vld [vmem:[%s3469_s29] sm:$0x3f] }
 0x2cb   : > { %v3911_v60 = vmul.f32 2.0, %v3908_v36  ;;  %v1954_v27 = vand.u32 2139095040, %v3908_v36  ;;  %v1951_v48 = vand.u32 2147483647, %v3908_v36 }
 0x2cd   : > { %v2164_v13 = vand.u32 2139095040, %v3911_v60  ;;  %v1955_v2 = vshrl.u32 %v1954_v27, 23 }
 0x2cf   : > { %v2165_v40 = vshrl.u32 %v2164_v13, 23  ;;  %v2697_v25 = vadd.s32 4294967169, %v1955_v2 }
 0x2d1   : > { %v2705_v46 = vadd.s32 4294967169, %v2165_v40  ;;  %v1961_v3 = vadd.s32 1, %v2697_v25 }
 0x2d3   : > { %v2171_v41 = vadd.s32 1, %v2705_v46  ;;  %vm1962_vm3 = vcmp.gt.s32.totalorder %v1961_v3, 0 }
 0x2d4   : > { %v1963_v42 = vsel %vm1962_vm3, %v1961_v3, 0  ;;  %vm1953_vm3 = vcmp.lt.s32.totalorder %v3908_v36, 0 }
 0x2d5   : > { %vm2172_vm4 = vcmp.gt.s32.totalorder %v2171_v41, 0 }
 0x2d6   : > { %v2173_v56 = vsel %vm2172_vm4, %v2171_v41, 0  ;;  %vm2163_vm4 = vcmp.lt.s32.totalorder %v3911_v60, 0 }
 0x2d7   : > { %v2175_v45 = vand.u32 31, %v2173_v56 }
 0x2d9   : > { %v3918_v54 = vsub.s32 32, %v2175_v45 }
 0x39c   : > { %v2788_v32 = vpop.f32.mrb[4].mxu0 }
 0x39d   : > { %v3140_v49 = vadd.low.f32.bf16 %v2788_v32, %v2987_v8  ;;  %v1302_v59 = vpop.f32.mrb[5].mxu0 }
 0x39e   : > { %v3141_v39 = vadd.low.f32.bf16 %v1302_v59, %v2982_v18  ;;  %v2789_v21 = vpop.f32.mrb[6].mxu0  ;;  %v2187_v59 = vshll.u32 %v3307_v35, %v2175_v45 }
 0x39f   : > { %v3142_v63 = vadd.high.f32.bf16 %v2789_v21, %v2987_v8  ;;  %v1305_v50 = vpop.f32.mrb[7].mxu0  ;;  %v1319_v0 = vmax.f32 %v3140_v49, 0.0  ;;  %v2161_v8 = vand.u32 2147483647, %v3911_v60 }
 0x3a0   : > { %v3143_v53 = vadd.high.f32.bf16 %v1305_v50, %v2982_v18  ;;  %v1317_v34 = vmax.f32 %v3141_v39, 0.0  ;;  %v3924_v18 = vshrl.u32 %v1963_v42, 5  ;;  %v1958_v39 = vand.u32 8388607, %v1951_v48 }
 0x3a1   : > { %v1320_v26 = vmax.f32 %v3142_v63, 0.0  ;;  %v2188_v50 = vshrl.u32 %v3308_v37, %v3918_v54 }
 0x3a2   : > { %v1318_v38 = vmax.f32 %v3143_v53, 0.0  ;;  %vm1986_vm5 = vcmp.lt.s32.totalorder %v3924_v18, 4  ;;  %vm1983_vm8 = vcmp.lt.s32.totalorder %v3924_v18, 1  ;;  %vm1985_vm9 = vcmp.lt.s32.totalorder %v3924_v18, 3 }
 0x3a3   : > { %v1326_v28 = vpack.c.bf16 %v1320_v26, %v1319_v0  ;;  %vm1984_vm11 = vcmp.lt.s32.totalorder %v3924_v18, 2 }
 0x3a4   : > { %v1325_v1 = vpack.c.bf16 %v1318_v38, %v1317_v34 }
 0x3a6   : > { %2790 = vmatprep.subr.bf16.mxu1 %v1325_v1 }
 0x3a7   : > { %2791 = vmatpush3.bf16.msra.mxu1 %v1325_v1  ;;  %v2190_v1 = vshll.u32 %v3308_v37, %v2175_v45 }
 0x3a8   : > { %2792 = vmatprep.subr.bf16.mxu1 %v1326_v28 }
 0x3ab   : > { %2793 = vmatpush3.bf16.msra.mxu1 %v1326_v28  ;;  %v3943_v28 = vshrl.u32 %v2173_v56, 5 }
 0x3ac   : > { %2806 = vmatprep.subr.bf16.mxu1 %v3843_v61 }
 0x3ad   : > { %vm2196_vm6 = vcmp.lt.s32.totalorder %v3943_v28, 4  ;;  %vm2193_vm13 = vcmp.lt.s32.totalorder %v3943_v28, 1  ;;  %vm2195_vm10 = vcmp.lt.s32.totalorder %v3943_v28, 3  ;;  %vm2194_vm12 = vcmp.lt.s32.totalorder %v3943_v28, 2 }
 0x3ae   : > { %2795 = vmatmul.mubr.msk.bf16.vlgmr.msra.gmra.mrb[4].mxu1 %vm1063_vm7, %v3862_v30 }
 0x3af   : > { %2807 = vmatpush3.bf16.msra.mxu1 %v3843_v61  ;;  %2814 = vmatprep.mubr.msk.bf16.mxu1 %vm1573_vm14, %v3822_v51 }
 0x3b0   : > { %2808 = vmatprep.subr.bf16.mxu1 %v3845_v19 }
 0x3b3   : > { %2809 = vmatpush3.bf16.msra.mxu1 %v3845_v19 }
 0x481   : > { %v2796_v7 = vpop.f32.mrb[4].mxu1 }
 0x482   : > { %v3144_v10 = vadd.low.f32.bf16 %v2796_v7, %v2997_v5  ;;  %v1401_v11 = vpop.f32.mrb[5].mxu1  ;;  %v2178_v7 = vshll.u32 %v3304_v29, %v2175_v45 }
 0x483   : > { %v3145_v14 = vadd.low.f32.bf16 %v1401_v11, %v2992_v23  ;;  %v2797_v15 = vpop.f32.mrb[6].mxu1  ;;  %v2181_v11 = vshll.u32 %v3305_v31, %v2175_v45 }
 0x484   : > { %v3146_v16 = vadd.high.f32.bf16 %v2797_v15, %v2997_v5  ;;  %v1404_v9 = vpop.f32.mrb[7].mxu1  ;;  %v1418_v22 = vmax.f32 %v3144_v10, 0.0  ;;  %v2191_v5 = vshrl.u32 %v3309_v44, %v3918_v54  ;;  %v2179_v10 = vshrl.u32 %v3305_v31, %v3918_v54 }
 0x485   : > { %v3147_v30 = vadd.high.f32.bf16 %v1404_v9, %v2992_v23  ;;  %v1416_v17 = vmax.f32 %v3145_v14, 0.0  ;;  %v2182_v14 = vshrl.u32 %v3306_v33, %v3918_v54  ;;  %v2184_v15 = vshll.u32 %v3306_v33, %v2175_v45 }
 0x486   : > { %v1419_v61 = vmax.f32 %v3146_v16, 0.0  ;;  %v2189_v9 = vor.u32 %v2188_v50, %v2187_v59 }
 0x487   : > { %v1417_v52 = vmax.f32 %v3147_v30, 0.0 }
 0x488   : > { %v1425_v20 = vpack.c.bf16 %v1419_v61, %v1418_v22  ;;  %v2168_v22 = vand.u32 8388607, %v2161_v8  ;;  %v2192_v61 = vor.u32 %v2191_v5, %v2190_v1 }
 0x489   : > { %v1424_v19 = vpack.c.bf16 %v1417_v52, %v1416_v17  ;;  %v1959_v17 = vor.u32 8388608, %v1958_v39  ;;  %v2183_v52 = vor.u32 %v2182_v14, %v2181_v11 }
 0x48a   : > { %v2169_v2 = vor.u32 8388608, %v2168_v22  ;;  %v2206_v40 = vsel %vm2196_vm6, %v2192_v61, 1326507024 }
 0x48b   : > { %2798 = vmatprep.subr.bf16.mxu0 %v1424_v19  ;;  %v1999_v3 = vshll.u32 %v1959_v17, 8  ;;  %v2207_v45 = vsel %vm2195_vm10, %v2189_v9, %v2206_v40 }
 0x48c   : > { %2799 = vmatpush3.bf16.msra.mxu0 %v1424_v19  ;;  %v2202_v19 = vsel %vm2196_vm6, %v2189_v9, 920167782 }
 0x48d   : > { %2800 = vmatprep.subr.bf16.mxu0 %v1425_v20 }
 0x490   : > { %2801 = vmatpush3.bf16.msra.mxu0 %v1425_v20 }
 0x493   : > { %2803 = vmatmul.mubr.msk.bf16.vlgmr.msra.gmra.mrb[8].mxu0 %vm1063_vm7, %v3866_v24  ;;  %v1965_v24 = vand.u32 31, %v1963_v42 }
 0x495   : > { %v3915_v47 = vsub.s32 32, %v1965_v24  ;;  %v1977_v6 = vshll.u32 %v3307_v35, %v1965_v24  ;;  %v1980_v32 = vshll.u32 %v3308_v37, %v1965_v24  ;;  %v1968_v21 = vshll.u32 %v3304_v29, %v1965_v24 }
 0x496   : > { %v1971_v53 = vshll.u32 %v3305_v31, %v1965_v24  ;;  %v1974_v26 = vshll.u32 %v3306_v33, %v1965_v24 }
 0x497   : > { %v1978_v57 = vshrl.u32 %v3308_v37, %v3915_v47  ;;  %v1981_v49 = vshrl.u32 %v3309_v44, %v3915_v47  ;;  %v1969_v63 = vshrl.u32 %v3305_v31, %v3915_v47  ;;  %v1972_v0 = vshrl.u32 %v3306_v33, %v3915_v47 }
 0x498   : > { %v1975_v34 = vshrl.u32 %v3307_v35, %v3915_v47  ;;  %v2185_v37 = vshrl.u32 %v3307_v35, %v3918_v54  ;;  %v2180_v35 = vor.u32 %v2179_v10, %v2178_v7 }
 0x499   : > { %v1979_v38 = vor.u32 %v1978_v57, %v1977_v6  ;;  %v1982_v23 = vor.u32 %v1981_v49, %v1980_v32  ;;  %v1970_v16 = vor.u32 %v1969_v63, %v1968_v21  ;;  %v1973_v44 = vor.u32 %v1972_v0, %v1971_v53 }
 0x49a   : > { %v1976_v30 = vor.u32 %v1975_v34, %v1974_v26  ;;  %v2186_v20 = vor.u32 %v2185_v37, %v2184_v15  ;;  %v2201_v41 = vsel %vm2193_vm13, %v2180_v35, %v2183_v52  ;;  %v2209_v57 = vshll.u32 %v2169_v2, 8 }
 0x49b   : > { %v1992_v31 = vsel %vm1986_vm5, %v1979_v38, 920167782  ;;  %v1996_v33 = vsel %vm1986_vm5, %v1982_v23, 1326507024  ;;  %v1991_v27 = vsel %vm1983_vm8, %v1970_v16, %v1973_v44  ;;  %v1967_v21 = vshrl.u32 %v3304_v29, %v3915_v47 }
 0x49c   : > { %v1993_v13 = vsel %vm1985_vm9, %v1976_v30, %v1992_v31  ;;  %v1995_v25 = vsel %vm1983_vm8, %v1973_v44, %v1976_v30  ;;  %v1997_v46 = vsel %vm1985_vm9, %v1979_v38, %v1996_v33  ;;  %v2203_v42 = vsel %vm2195_vm10, %v2186_v20, %v2202_v19 }
 0x49d   : > { %v1994_v56 = vsel %vm1984_vm11, %v1991_v27, %v1993_v13  ;;  %v2205_v24 = vsel %vm2193_vm13, %v2183_v52, %v2186_v20  ;;  %v1998_v6 = vsel %vm1984_vm11, %v1995_v25, %v1997_v46  ;;  %v2204_v32 = vsel %vm2194_vm12, %v2201_v41, %v2203_v42 }
 0x49e   : > { %v3997_v49 = vmul.u32.u64.low %v1999_v3, %v1994_v56  ;;  %v3998_v59 = vmul.u32.u64.high %v1999_v3, %v1994_v56, %v3997_v49  ;;  %v2208_v39 = vsel %vm2194_vm12, %v2205_v24, %v2207_v45  ;;  %v1988_v53 = vsel %vm1986_vm5, %v1976_v30, 2102212464 }
 0x49f   : > { %v4006_v63 = vmul.u32.u64.low %v1999_v3, %v1998_v6  ;;  %v4007_v50 = vmul.u32.u64.high %v1999_v3, %v1998_v6, %v4006_v63  ;;  %v4011_v0 = vmul.u32.u64.low %v2209_v57, %v2204_v32  ;;  %v4012_v26 = vmul.u32.u64.high %v2209_v57, %v2204_v32, %v4011_v0 }
 0x4a0   : > { %v2177_v34 = vshrl.u32 %v3304_v29, %v3918_v54  ;;  %v4016_v38 = vmul.u32.u64.low %v2209_v57, %v2208_v39  ;;  %v4017_v1 = vmul.u32.u64.high %v2209_v57, %v2208_v39, %v4016_v38  ;;  %v2198_v51 = vsel %vm2196_vm6, %v2186_v20, 2102212464 }
 0x4a1   : > { %v1987_v47 = vsel %vm1983_vm8, %v1967_v21, %v1970_v16  ;;  %v1989_v5 = vsel %vm1985_vm9, %v1973_v44, %v1988_v53  ;;  %v2199_v7 = vsel %vm2195_vm10, %v2183_v52, %v2198_v51  ;;  %v2009_v54 = vadd.s32 1, %v3998_v59 }
 0x4a2   : > { %v2197_v23 = vsel %vm2193_vm13, %v2177_v34, %v2180_v35  ;;  %v1990_v29 = vsel %vm1984_vm11, %v1987_v47, %v1989_v5  ;;  %vm2008_vm15 = vc.u32 %v4007_v50, %v3997_v49  ;;  %v2219_v11 = vadd.s32 1, %v4012_v26 }
 0x4a3   : > { %v2200_v10 = vsel %vm2194_vm12, %v2197_v23, %v2199_v7  ;;  %v2006_v14 = vmul.u32 %v1999_v3, %v1990_v29  ;;  %vm2218_vm0 = vc.u32 %v4017_v1, %v4011_v0  ;;  %v2010_v15 = vsel %vm2008_vm15, %v2009_v54, %v3998_v59 }
 0x4a4   : > { %v2216_v37 = vmul.u32 %v2209_v57, %v2200_v10  ;;  %v2220_v16 = vsel %vm2218_vm0, %v2219_v11, %v4012_v26  ;;  %v2007_v42 = vadd.s32 %v3997_v49, %v4007_v50  ;;  %v2217_v45 = vadd.s32 %v4011_v0, %v4017_v1 }
 0x4a5   : > { %v2011_v44 = vadd.s32 %v2010_v15, %v2006_v14  ;;  %vm1952_vm5 = vcmp.le.f32.partialorder %v1951_v48, 0.7853982  ;;  %vm2162_vm6 = vcmp.le.f32.partialorder %v2161_v8, 0.7853982 }
 0x4a6   : > { %v2221_v18 = vadd.s32 %v2220_v16, %v2216_v37 }
 0x4a7   : > { %v2012_v9 = vadd.s32 536870912, %v2011_v44 }
 0x4a8   : > { %v2222_v30 = vadd.s32 536870912, %v2221_v18 }
 0x4a9   : > { %v2013_v22 = vshrl.u32 %v2012_v9, 30 }
 0x4aa   : > { %v2223_v61 = vshrl.u32 %v2222_v30, 30 }
 0x4ab   : > { %v2014_v17 = vshll.u32 %v2013_v22, 30  ;;  %v2037_v10 = vsub.s32 4, %v2013_v22 }
 0x4ac   : > { %v2224_v31 = vshll.u32 %v2223_v61, 30  ;;  %v2247_v14 = vsub.s32 4, %v2223_v61 }
 0x4ad   : > { %v2015_v28 = vsub.s32 %v2011_v44, %v2014_v17  ;;  %v2038_v37 = vsel %vm1953_vm3, %v2037_v10, %v2013_v22 }
 0x4ae   : > { %v2225_v33 = vsub.s32 %v2221_v18, %v2224_v31  ;;  %v2248_v16 = vsel %vm2163_vm4, %v2247_v14, %v2223_v61  ;;  %v2040_v44 = vsel %vm1952_vm5, 0, %v2038_v37 }
 0x4af   : > { %v2017_v35 = vsub.s32 0, %v2015_v28  ;;  %v2250_v18 = vsel %vm2162_vm6, 0, %v2248_v16  ;;  %v2044_v48 = vadd.s32 3, %v2040_v44 }
 0x4b0   : > { %v2227_v52 = vsub.s32 0, %v2225_v33  ;;  %v2254_v9 = vadd.s32 3, %v2250_v18 }
 0x4b1   : > { %v2698_v20 = vmin.u32 %v2017_v35, %v2015_v28  ;;  %v2045_v8 = vand.u32 3, %v2044_v48 }
 0x4b2   : > { %v2706_v19 = vmin.u32 %v2227_v52, %v2225_v33  ;;  %v2255_v35 = vand.u32 3, %v2254_v9  ;;  %v2359_v52 = vand.u32 3, %v2250_v18 }
 0x4b3   : > { %v2019_v27 = vclz %v2698_v20  ;;  %v3002_v20 = vpop.permute.xlu0 %3001  ;;  %vm2047_vm8 = vcmp.eq.s32.totalorder %v2045_v8, 0  ;;  %vm2050_vm9 = vcmp.eq.s32.totalorder %v2045_v8, 2 }
 0x4b4   : > { %v2229_v13 = vclz %v2706_v19  ;;  %v3007_v19 = vpop.permute.xlu1 %3006  ;;  %vm2257_vm10 = vcmp.eq.s32.totalorder %v2255_v35, 0  ;;  %vm2260_vm12 = vcmp.eq.s32.totalorder %v2255_v35, 2  ;;  %vm2361_vm15 = vcmp.eq.s32.totalorder %v2359_v52, 0 }
 0x4b5   : > { %v2699_v2 = vadd.s32 4294967294, %v2019_v27  ;;  %vm2364_vm0 = vcmp.eq.s32.totalorder %v2359_v52, 2 }
 0x4b6   : > { %v2707_v40 = vadd.s32 4294967294, %v2229_v13 }
 0x4b7   : > { %vm2700_vm1 = vcmp.lt.s32.totalorder %v2699_v2, 0 }
 0x4b8   : > { %vm2708_vm2 = vcmp.lt.s32.totalorder %v2707_v40, 0  ;;  %v2022_v25 = vsel %vm2700_vm1, 0, %v2699_v2  ;;  %vm2046_vm1 = vcmp.lt.s32.totalorder %v2045_v8, 2 }
 0x4b9   : > { %v2232_v46 = vsel %vm2708_vm2, 0, %v2707_v40  ;;  %v2027_v3 = vsub.s32 4294967266, %v2022_v25  ;;  %v2023_v56 = vsub.s32 32, %v2022_v25  ;;  %v2024_v32 = vshll.u32 %v2015_v28, %v2022_v25 }
 0x4ba   : > { %v2237_v41 = vsub.s32 4294967266, %v2232_v46  ;;  %v2233_v6 = vsub.s32 32, %v2232_v46  ;;  %v2234_v21 = vshll.u32 %v2225_v33, %v2232_v46  ;;  %v2149_v28 = vand.u32 3, %v2040_v44 }
 0x4bb   : > { %v2028_v24 = vadd.s32 127, %v2027_v3  ;;  %v2025_v59 = vshrl.u32 %v2007_v42, %v2023_v56 }
 0x4bc   : > { %v2238_v57 = vadd.s32 127, %v2237_v41  ;;  %v2235_v63 = vshrl.u32 %v2217_v45, %v2233_v6  ;;  %vm2151_vm11 = vcmp.eq.s32.totalorder %v2149_v28, 0  ;;  %vm2154_vm13 = vcmp.eq.s32.totalorder %v2149_v28, 2 }
 0x4bd   : > { %v2029_v39 = vshll.u32 %v2028_v24, 23  ;;  %v2026_v26 = vor.u32 %v2025_v59, %v2024_v32  ;;  %vm2150_vm2 = vcmp.lt.s32.totalorder %v2149_v28, 2 }
 0x4be   : > { %v2239_v53 = vshll.u32 %v2238_v57, 23  ;;  %v2236_v38 = vor.u32 %v2235_v63, %v2234_v21 }
 0x4bf   : > { %v2030_v34 = vor.u32 4788187, %v2029_v39  ;;  %v2033_v5 = vcvt.s32.f32 %v2026_v26 }
 0x4c0   : > { %v2240_v51 = vor.u32 4788187, %v2239_v53  ;;  %v2243_v49 = vcvt.s32.f32 %v2236_v38 }
 0x4c1   : > { %v2031_v47 = vand.u32 2147483647, %v2030_v34 }
 0x4c2   : > { %v2241_v23 = vand.u32 2147483647, %v2240_v51 }
 0x4c3   : > { %v2034_v50 = vmul.f32 %v2033_v5, %v2031_v47 }
 0x4c4   : > { %v2244_v7 = vmul.f32 %v2243_v49, %v2241_v23 }
 0x4c5   : > { %v2035_v29 = vxor.u32 2147483648, %v2034_v50 }
 0x4c6   : > { %v2245_v0 = vxor.u32 2147483648, %v2244_v7 }
 0x4c7   : > { %v2036_v1 = vsel %vm1953_vm3, %v2035_v29, %v2034_v50  ;;  %vm2256_vm3 = vcmp.lt.s32.totalorder %v2255_v35, 2 }
 0x4c8   : > { %v2246_v54 = vsel %vm2163_vm4, %v2245_v0, %v2244_v7  ;;  %v2039_v11 = vsel %vm1952_vm5, %v3908_v36, %v2036_v1  ;;  %vm2360_vm4 = vcmp.lt.s32.totalorder %v2359_v52, 2  ;;  %vm2043_vm5 = vweird.f32 %v3908_v36  ;;  %v3127_v0 = vld [vmem:[#allocation6 + $0x60] sm:$0xff]   ;;  %v3012_v1 = vpop.permute.xlu0 %3011 }
 0x4c9   : > { %v2249_v15 = vsel %vm2162_vm6, %v3911_v60, %v2246_v54  ;;  %3110 = vcosq.f32 %v2039_v11  ;;  %vm2253_vm6 = vweird.f32 %v3911_v60  ;;  %2822 = vmatprep.mubr.msk.bf16.mxu0 %vm1063_vm7, %v3127_v0 }
 0x4ca   : > { %3112 = vsinq.f32 %v2039_v11 }
 0x4cb   : > { %3114 = vcosq.f32 %v2249_v15 }
 0x4cc   : > { %3116 = vsinq.f32 %v2249_v15  ;;  %v3022_v28 = vpop.permute.xlu0 %3021 }
 0x4d3   : > { %v3111_v30 = vpop.eup %3110 }
 0x4d4   : > { %v3113_v17 = vpop.eup %3112  ;;  %v2051_v22 = vxor.u32 2147483648, %v3111_v30 }
 0x4d5   : > { %v3115_v31 = vpop.eup %3114  ;;  %v2048_v27 = vxor.u32 2147483648, %v3113_v17 }
 0x4d6   : > { %v3117_v33 = vpop.eup %3116  ;;  %v2261_v13 = vxor.u32 2147483648, %v3115_v31  ;;  %v2052_v40 = vsel %vm2050_vm9, %v2051_v22, %v3113_v17  ;;  %v2156_v46 = vsel %vm2154_vm13, %v2051_v22, %v3113_v17 }
 0x4d7   : > { %v2258_v61 = vxor.u32 2147483648, %v3117_v33  ;;  %v2049_v2 = vsel %vm2047_vm8, %v3111_v30, %v2048_v27  ;;  %v2153_v25 = vsel %vm2151_vm11, %v3111_v30, %v2048_v27  ;;  %vm2453_vm11 = vcmask 130048  }
 0x4d8   : > { %v2262_v42 = vsel %vm2260_vm12, %v2261_v13, %v3117_v33  ;;  %v2366_v24 = vsel %vm2364_vm0, %v2261_v13, %v3117_v33  ;;  %v2053_v57 = vsel %vm2046_vm1, %v2049_v2, %v2052_v40  ;;  %v2157_v59 = vsel %vm2150_vm2, %v2153_v25, %v2156_v46 }
 0x4d9   : > { %v2259_v41 = vsel %vm2257_vm10, %v3115_v31, %v2258_v61  ;;  %v2363_v56 = vsel %vm2361_vm15, %v3115_v31, %v2258_v61  ;;  %v2054_v51 = vsel %vm2043_vm5, nan, %v2053_v57  ;;  %v2158_v23 = vsel %vm2043_vm5, nan, %v2157_v59 }
 0x4da   : > { %v2263_v26 = vsel %vm2256_vm3, %v2259_v41, %v2262_v42  ;;  %v2367_v34 = vsel %vm2360_vm4, %v2363_v56, %v2366_v24  ;;  %v3032_v41 = vpop.permute.xlu0 %3031 }
 0x4db   : > { %v2264_v50 = vsel %vm2253_vm6, nan, %v2263_v26  ;;  %v2368_v60 = vsel %vm2253_vm6, nan, %v2367_v34  ;;  %v3129_v34 = vld [vmem:[#allocation6 + $0x80] sm:$0xff]  }
 0x566   : > { %v2804_v3 = vpop.f32.mrb[8].mxu0 }
 0x567   : > { %v3148_v45 = vadd.low.f32.bf16 %v2804_v3, %v3007_v19  ;;  %v1500_v6 = vpop.f32.mrb[9].mxu0 }
 0x568   : > { %v3149_v32 = vadd.low.f32.bf16 %v1500_v6, %v3002_v20  ;;  %v2805_v39 = vpop.f32.mrb[10].mxu0 }
 0x569   : > { %v1517_v21 = vmax.f32 %v3148_v45, 0.0  ;;  %v3150_v63 = vadd.high.f32.bf16 %v2805_v39, %v3007_v19  ;;  %v1503_v53 = vpop.f32.mrb[11].mxu0 }
 0x56a   : > { %v1515_v38 = vmax.f32 %v3149_v32, 0.0  ;;  %v3151_v47 = vadd.high.f32.bf16 %v1503_v53, %v3002_v20 }
 0x56b   : > { %v1518_v5 = vmax.f32 %v3150_v63, 0.0 }
 0x56c   : > { %1519 = vst [vmem:[#allocation2 + $0x20] sm:$0xff] %v1515_v38  ;;  %v1516_v49 = vmax.f32 %v3151_v47, 0.0 }
 0x56d   : > { %1950 = vst [vmem:[#allocation2 + $0x1d] sm:$0x38] %v3908_v36  ;;  %2055 = vst [vmem:[#allocation2 + $0x20] sm:$0x38] %v2054_v51  ;;  %v1538_v7 = vpack.c.bf16 %v1518_v5, %v1517_v21  ;;  %v3017_v36 = vpop.permute.xlu1 %3016  ;;  %v3042_v51 = vpop.permute.xlu0 %3041 }
 0x56e   : > { %1520 = vst [vmem:[#allocation2 + $0x28] sm:$0xff] %v1516_v49  ;;  %v1537_v29 = vpack.c.bf16 %v1516_v49, %v1515_v38  ;;  %v2693_v38 = vcombine.low %v3886_v12, %v3886_v12 }
 0x56f   : > { %2159 = vst [vmem:[#allocation2 + $0x26] sm:$0x38] %v2158_v23  ;;  %2265 = vst [vmem:[#allocation2 + $0x23] sm:$0x38] %v2264_v50 }
 0x570   : > { %2369 = vst [vmem:[#allocation2 + $0x29] sm:$0x38] %v2368_v60  ;;  %2810 = vmatprep.subr.bf16.mxu1 %v1537_v29 }
 0x571   : > { %2811 = vmatpush3.bf16.msra.mxu1 %v1537_v29  ;;  %v3027_v31 = vpop.permute.xlu1 %3026 }
 0x572   : > { %2812 = vmatprep.subr.bf16.mxu1 %v1538_v7 }
 0x575   : > { %2813 = vmatpush3.bf16.msra.mxu1 %v1538_v7 }
 0x576   : > { %2834 = vmatprep.subr.bf16.mxu1 %v3310_v4 }
 0x578   : > { %2815 = vmatmul.mubr.msk.bf16.vlgmr.msra.gmra.mrb[8].mxu1 %vm1573_vm14, %v3870_v43  ;;  %v3128_v43 = vld [vmem:[#allocation6 + $0x70] sm:$0xff]   ;;  %vm3312_vm14 = vmmov 0  }
 0x579   : > { %2838 = vmatprep.mubr.msk.bf16.mxu1 %vm3312_vm14, %v3310_v4 }
 0x64b   : > { %v2816_v54 = vpop.f32.mrb[8].mxu1 }
 0x64c   : > { %v3152_v10 = vadd.low.f32.bf16 %v2816_v54, %v3017_v36  ;;  %v1614_v11 = vpop.f32.mrb[9].mxu1 }
 0x64d   : > { %v3153_v14 = vadd.low.f32.bf16 %v1614_v11, %v3012_v1  ;;  %v2817_v15 = vpop.f32.mrb[10].mxu1  ;;  %v2374_v11 = vld [vmem:[#allocation2 + $0x20] sm:$0xff] }
 0x64e   : > { %v3154_v37 = vadd.high.f32.bf16 %v2817_v15, %v3017_v36  ;;  %v1617_v16 = vpop.f32.mrb[11].mxu1  ;;  %v1631_v18 = vmax.f32 %v3152_v10, 0.0 }
 0x64f   : > { %v3155_v44 = vadd.high.f32.bf16 %v1617_v16, %v3012_v1  ;;  %v1629_v9 = vmax.f32 %v3153_v14, 0.0  ;;  %v2375_v14 = vld [vmem:[#allocation2 + $0x28] sm:$0xff] }
 0x650   : > { %v1632_v48 = vmax.f32 %v3154_v37, 0.0 }
 0x651   : > { %v1630_v30 = vmax.f32 %v3155_v44, 0.0  ;;  %v2380_v44 = vpack.c.bf16 %v2375_v14, %v2374_v11 }
 0x652   : > { %v1638_v17 = vpack.c.bf16 %v1632_v48, %v1631_v18  ;;  %v3130_v48 = vld [vmem:[#allocation6 + $0x98] sm:$0xff]  }
 0x653   : > { %v1637_v8 = vpack.c.bf16 %v1630_v30, %v1629_v9 }
 0x655   : > { %2818 = vmatprep.subr.bf16.mxu0 %v1637_v8 }
 0x656   : > { %2819 = vmatpush3.bf16.msra.mxu0 %v1637_v8 }
 0x657   : > { %2820 = vmatprep.subr.bf16.mxu0 %v1638_v17 }
 0x65a   : > { %2821 = vmatpush3.bf16.msra.mxu0 %v1638_v17 }
 0x65d   : > { %2823 = vmatmul.mubr.msk.bf16.vlgmr.msra.gmra.mrb[12].mxu0 %vm1063_vm7, %v3874_v55  ;;  %v3037_v55 = vpop.permute.xlu1 %3036 }
 0x65e   : > { %2830 = vmatprep.mubr.msk.bf16.mxu0 %vm1063_vm7, %v3128_v43 }
 0x661   : > { %v3047_v29 = vpop.permute.xlu1 %3046 }
 0x665   : > { %v1866_v15 = vpop.permute.xlu1 %1865 }
 0x730   : > { %v2824_v33 = vpop.f32.mrb[12].mxu0 }
 0x731   : > { %v3156_v35 = vadd.low.f32.bf16 %v2824_v33, %v3027_v31  ;;  %v1713_v52 = vpop.f32.mrb[13].mxu0 }
 0x732   : > { %v3157_v20 = vadd.low.f32.bf16 %v1713_v52, %v3022_v28  ;;  %v2825_v19 = vpop.f32.mrb[14].mxu0 }
 0x733   : > { %v3158_v27 = vadd.high.f32.bf16 %v2825_v19, %v3027_v31  ;;  %v1716_v22 = vpop.f32.mrb[15].mxu0  ;;  %v1730_v13 = vmax.f32 %v3156_v35, 0.0 }
 0x734   : > { %v3159_v61 = vadd.high.f32.bf16 %v1716_v22, %v3022_v28  ;;  %v1728_v40 = vmax.f32 %v3157_v20, 0.0 }
 0x735   : > { %v1731_v2 = vmax.f32 %v3158_v27, 0.0 }
 0x736   : > { %v1729_v25 = vmax.f32 %v3159_v61, 0.0 }
 0x737   : > { %v1737_v46 = vpack.c.bf16 %v1731_v2, %v1730_v13 }
 0x738   : > { %v1736_v3 = vpack.c.bf16 %v1729_v25, %v1728_v40 }
 0x73a   : > { %2826 = vmatprep.subr.bf16.mxu0 %v1736_v3 }
 0x73b   : > { %2827 = vmatpush3.bf16.msra.mxu0 %v1736_v3 }
 0x73c   : > { %2828 = vmatprep.subr.bf16.mxu0 %v1737_v46 }
 0x73f   : > { %2829 = vmatpush3.bf16.msra.mxu0 %v1737_v46 }
 0x740   : > { %2850 = vmatprep.subr.bf16.mxu0 %v3310_v4 }
 0x742   : > { %2831 = vmatmul.mubr.msk.bf16.vlgmr.msra.gmra.mrb[16].mxu0 %vm1063_vm7, %v3878_v58 }
 0x743   : > { %2856 = vmatprep.mubr.msk.bf16.mxu0 %vm3312_vm14, %v3310_v4 }
 0x815   : > { %v2832_v42 = vpop.f32.mrb[16].mxu0 }
 0x816   : > { %v3160_v56 = vadd.low.f32.bf16 %v2832_v42, %v3037_v55  ;;  %v1812_v24 = vpop.f32.mrb[17].mxu0 }
 0x817   : > { %v3161_v45 = vadd.low.f32.bf16 %v1812_v24, %v3032_v41  ;;  %v2833_v6 = vpop.f32.mrb[18].mxu0  ;;  %v3131_v24 = vld [vmem:[#allocation6 + $0xa0] sm:$0x3] }
 0x818   : > { %v3162_v57 = vadd.high.f32.bf16 %v2833_v6, %v3037_v55  ;;  %v1815_v32 = vpop.f32.mrb[19].mxu0  ;;  %v1829_v39 = vmax.f32 %v3160_v56, 0.0 }
 0x819   : > { %v3163_v59 = vadd.high.f32.bf16 %v1815_v32, %v3032_v41  ;;  %v1827_v58 = vmax.f32 %v3161_v45, 0.0 }
 0x81a   : > { %v1830_v21 = vmax.f32 %v3162_v57, 0.0 }
 0x81b   : > { %v1828_v63 = vmax.f32 %v3163_v59, 0.0 }
 0x81c   : > { %v1837_v53 = vpack.c.bf16 %v1830_v21, %v1829_v39 }
 0x81d   : > { %v1836_v26 = vpack.c.bf16 %v1828_v63, %v1827_v58 }
 0x81f   : > { %2835 = vmatpush3.bf16.msra.mxu1 %v1836_v26 }
 0x820   : > { %2836 = vmatprep.subr.bf16.mxu1 %v3310_v4 }
 0x823   : > { %2837 = vmatpush3.bf16.msra.mxu1 %v1837_v53 }
 0x826   : > { %2839 = vmatmul.mubr.msk.bf16.vlgmr.msra.gmra.mrb[12].mxu1 %vm1063_vm7, %v3129_v34 }
 0x827   : > { %2842 = vmatprep.mubr.msk.bf16.mxu1 %vm3312_vm14, %v3310_v4 }
 0x82e   : > { %2843 = vmatmul.mubr.msk.bf16.gmra.mrb[16].mxu1 %vm1063_vm7, %v3882_v62 }
 0x82f   : > { %2846 = vmatprep.mubr.msk.bf16.mxu1 %vm3312_vm14, %v3310_v4 }
 0x836   : > { %2847 = vmatmul.mubr.msk.bf16.gmra.mrb[20].mxu1 %vm1063_vm7, %v2693_v38  ;;  %vm2398_vm7 = vcmask 392192  }
 0x8f9   : > { %v1924_v47 = vpop.f32.mrb[12].mxu1 }
 0x8fa   : > { %v3164_v5 = vadd.low.f32.bf16 %v1924_v47, %v3042_v51  ;;  %v2840_v23 = vpop.f32.mrb[13].mxu1 }
 0x8fb   : > { %v1927_v49 = vpop.f32.mrb[14].mxu1 }
 0x8fc   : > { %1946 = vst [vmem:[#allocation2] sm:$0xff] %v3164_v5  ;;  %v3165_v50 = vadd.high.f32.bf16 %v1927_v49, %v3042_v51  ;;  %v2841_v60 = vpop.f32.mrb[15].mxu1 }
 0x8fe   : > { %1947 = vst [vmem:[#allocation2 + $0x8] sm:$0xff] %v3165_v50  ;;  %v2378_v7 = vpack.c.bf16 %v3165_v50, %v3164_v5 }
 0x900   : > { %2851 = vmatpush3.bf16.msra.mxu0 %v2378_v7 }
 0x901   : > { %v1932_v62 = vpop.f32.mrb[16].mxu1  ;;  %2852 = vmatprep.subr.bf16.mxu0 %v3310_v4 }
 0x902   : > { %v3166_v0 = vadd.low.f32.bf16 %v1932_v62, %v3047_v29  ;;  %v2844_v36 = vpop.f32.mrb[17].mxu1 }
 0x903   : > { %v1935_v12 = vpop.f32.mrb[18].mxu1 }
 0x904   : > { %1948 = vst [vmem:[#allocation2 + $0x10] sm:$0xff] %v3166_v0  ;;  %v3167_v1 = vadd.high.f32.bf16 %v1935_v12, %v3047_v29  ;;  %v2845_v54 = vpop.f32.mrb[19].mxu1 }
 0x906   : > { %1949 = vst [vmem:[#allocation2 + $0x18] sm:$0xff] %v3167_v1  ;;  %v2379_v10 = vpack.c.bf16 %v3167_v1, %v3166_v0 }
 0x908   : > { %2853 = vmatpush3.bf16.msra.mxu0 %v2379_v10 }
 0x909   : > { %v1940_v37 = vpop.f32.mrb[20].mxu1  ;;  %2854 = vmatprep.subr.bf16.mxu0 %v3310_v4 }
 0x90a   : > { %v1941_v16 = vadd.f32 %v1940_v37, %v1866_v15  ;;  %v2848_v18 = vpop.f32.mrb[21].mxu1 }
 0x90b   : > { %v1943_v9 = vpop.f32.mrb[22].mxu1 }
 0x90c   : > { %v2504_v30 = vmul.f32 10.0, %v1941_v16  ;;  %2855 = vmatpush3.bf16.msra.mxu0 %v2380_v44  ;;  %v2849_v17 = vpop.f32.mrb[23].mxu1 }
 0x90d   : > { %2860 = vmatprep.subr.bf16.mxu0 %v3310_v4 }
 0x90e   : > { %v2506_v8 = vmin.f32 %v2504_v30, 20.0  ;;  %vm2505_vm9 = vcmp.gt.f32.partialorder %v2504_v30, 20.0 }
 0x90f   : > { %2857 = vmatmul.mubr.msk.bf16.vlgmr.msra.gmra.mrb[20].mxu0 %vm2398_vm7, %v3130_v48 }
 0x910   : > { %v2507_v43 = vmul.f32 1.442695, %v2506_v8  ;;  %2862 = vmatprep.mubr.msk.bf16.mxu0 %vm3312_vm14, %v3310_v4  ;;  %v3052_v4 = vpop.permute.xlu0 %3051 }
 0x912   : > { %3118 = vpow2.f32 %v2507_v43 }
 0x914   : > { %v2451_v45 = vpop.permute.xlu0 %2450 }
 0x91c   : > { %v3119_v31 = vpop.eup %3118 }
 0x91d   : > { %v2509_v28 = vadd.f32 1.0, %v3119_v31  ;;  %v2512_v33 = vmul.f32 -0.5, %v3119_v31  ;;  %v2515_v52 = vand.u32 2147483647, %v3119_v31 }
 0x91f   : > { %3120 = vlog2.f32 %v2509_v28  ;;  %v2513_v35 = vadd.f32 1.0, %v2512_v33  ;;  %vm2516_vm8 = vcmp.lt.f32.partialorder %v2515_v52, 0.0004427343 }
 0x921   : > { %v2514_v27 = vmul.f32 %v3119_v31, %v2513_v35 }
 0x929   : > { %v3121_v20 = vpop.eup %3120 }
 0x92a   : > { %v2511_v19 = vmul.f32 0.6931472, %v3121_v20 }
 0x92c   : > { %v2517_v22 = vsel %vm2516_vm8, %v2514_v27, %v2511_v19 }
 0x92d   : > { %v2519_v61 = vmul.f32 0.1, %v2517_v22 }
 0x92f   : > { %v2520_v13 = vsel %vm2505_vm9, %v1941_v16, %v2519_v61 }
 0x930   : > { %2521 = vst [vmem:[%s4090_s17 + $0x3] sm:$0x1] %v2520_v13 }
 0x9e2   : > { %v2436_v2 = vpop.f32.mrb[20].mxu0 }
 0x9e3   : > { %v3168_v40 = vadd.low.f32.bf16 %v2436_v2, %v3052_v4  ;;  %v2858_v25 = vpop.f32.mrb[21].mxu0 }
 0x9e4   : > { %v2439_v46 = vpop.f32.mrb[22].mxu0 }
 0x9e5   : > { %v3169_v3 = vadd.high.f32.bf16 %v2439_v46, %v3052_v4  ;;  %v2859_v55 = vpop.f32.mrb[23].mxu0  ;;  %v2443_v41 = vmax.f32 %v3168_v40, 0.0 }
 0x9e7   : > { %v2444_v42 = vmax.f32 %v3169_v3, 0.0 }
 0x9e9   : > { %v2446_v56 = vpack.c.bf16 %v2444_v42, %v2443_v41 }
 0x9eb   : > { %2861 = vmatpush3.bf16.msra.mxu0 %v2446_v56 }
 0x9ee   : > { %2863 = vmatmul.mubr.msk.bf16.vlgmr.msra.gmra.mrb[24].mxu0 %vm2453_vm11, %v3131_v24 }
 0xac1   : > { %v2491_v6 = vpop.f32.mrb[24].mxu0 }
 0xac2   : > { %v2492_v57 = vadd.f32 %v2491_v6, %v2451_v45  ;;  %v2864_v32 = vpop.f32.mrb[25].mxu0 }
 0xac3   : > { %v2494_v59 = vpop.f32.mrb[26].mxu0 }
 0xac4   : > { %v2716_v39 = vmul.f32 -1.442695, %v2492_v57  ;;  %v2865_v21 = vpop.f32.mrb[27].mxu0 }
 0xac6   : > { %3122 = vpow2.f32 %v2716_v39 }
 0xad0   : > { %v3123_v58 = vpop.eup %3122 }
 0xad1   : > { %v2500_v63 = vadd.f32 1.0, %v3123_v58 }
 0xad3   : > { %3124 = vrcp.f32 %v2500_v63 }
 0xadd   : > { %v3125_v53 = vpop.eup %3124 }
 0xade   : > { %2503 = vst [vmem:[%s4090_s17] sm:$0x7] %v3125_v53 }
 0xadf   : > { %3241 = shalt.err (!%p3238_p7)
}
 0xae0   : > { %s3242_s7 = scalar_lea.hbm %s4098_s30, 64  ;;  %s3246_s25 = scalar_lea.hbm %s4145_s2, 128 }
 0xae1   : > { %p3243_p9 = scmp.ne.s32.totalorder %s4098_s30, %s3242_s7  ;;  %p3247_p0 = scmp.lt.u32.totalorder %s4098_s30, %s4145_s2 }
 0xae2   : > { %p3248_p11 = scmp.lt.u32.totalorder %s3246_s25, %s3242_s7  ;;  %p3250_p4 = scmp.lt.u32.totalorder %s3242_s7, %s4098_s30 }
 0xae3   : > { %p3244_p2 = pnand %p3243_p9, %p3420_p12 }
 0xae4   : > { %p3249_p1 = por %p3248_p11, %p3247_p0 }
 0xae5   : > { %p3245_p5 = pneg %p3244_p2 }
 0xae6   : > { %p3251_p6 = por %p3250_p4, %p3249_p1 }
 0xae8   : > { %p3252_p8 = pnand %p3251_p6, %p3245_p5 }
 0xaea   : > { %3255 = shalt.err (!%p3252_p8)
}
 0xaeb   : > { %2896 = dma.vmem_to_hbm [thread:$0]  (%p3420_p12), %s4100_s22, 64, %s4098_s30, %s2523_s3  }
 0xaec PF: > { %s2548_s19 = sand.u32 1, %s3286_s9   ;;  %p4164_p10 = scmp.ne.s32.totalorder %s4150_s16, 0 }
 0xaed   : > { %p4165_p13 = scmp.ge.s32.totalorder %s3298_s12, 2  ;;  %s2549_s29 = scalar_lea.sflag [#allocation5], %s2548_s19 }
 0xaef   : > { %p2907_p3 = pnand %p4165_p13, %p4164_p10 }
 0xaf1   : > { %3281 = dma.done.wait (!%p2907_p3), %s2549_s29, 64  }
 0xaf2   : > { %3283 = vsyncadd (!%p2907_p3), %s2549_s29, 4294967232  ;;  %p16_p7 = scmp.ge.s32.totalorder %s3385_s21, 4   ;;  %s4166_s9 = smov %s3290_s10 }
 0xaf3   : > { %s4167_s10 = smov %s3294_s11  ;;  %s4168_s11 = smov %s3416_s8 }
 0xaf4   : > { %s4169_s12 = smov %s3385_s21  ;;  %18 = sbr.rel (!%p16_p7) target bundleno = 6 (0x6), region = 77 }
 0xafb   :  { %2554 = vsyncpa [#allocation4], 1 }
 0xafc   :  { %2556 = vsyncpa [#allocation4 + $0x1], 1 }
 0xafd   :  { %2557 = vsyncpa [#allocation7], 1 }
 0xafe   :  { %2558 = vsyncpa [#allocation5], 1 }
 0xaff   :  { %2560 = vsyncpa [#allocation5 + $0x1], 1 }

</bundles_post_ra>
